<compile_context>
chip_gen: v5e
topology: v5e:2x2
jax: 0.10.0
libtpu: 0.0.40
codegen_flags: <defaults>
</compile_context>

<pallas_src>
import functools
import math

import jax
import jax.numpy as jnp
from jax.experimental import pallas as pl
from jax.experimental.pallas import tpu as pltpu

_NEG_INF = -1e9


# ----------------------------- in-kernel math helpers -----------------------------

def _ln(x, g, b, eps):
    mu = jnp.mean(x, axis=-1, keepdims=True)
    var = jnp.mean(jnp.square(x - mu), axis=-1, keepdims=True)
    return (x - mu) * jax.lax.rsqrt(var + eps) * g + b


def _gelu(y):  # GPT-2 "gelu_new" (tanh approximation), kept in f32
    c = math.sqrt(2.0 / math.pi)
    return 0.5 * y * (1.0 + jnp.tanh(c * (y + 0.044715 * y * y * y)))


def _row_tile(m, target=256):
    """Largest multiple-of-8 divisor of m that is <= target and leaves >=2 grid steps."""
    if m % 8 != 0:
        return m
    limit = max(8, min(target, m // 2 if m >= 16 else m))
    best, t = 8, 8
    while t <= limit:
        if m % t == 0:
            best = t
        t += 8
    return best


# --------------------------------- Pallas kernels ----------------------------------

def _ln_qkv_kernel(h_ref, g_ref, b_ref, w_ref, wb_ref, o_ref, *, eps):
    x = _ln(h_ref[...], g_ref[...], b_ref[...], eps)                    # f32
    y = jnp.dot(x.astype(jnp.bfloat16), w_ref[...],
                preferred_element_type=jnp.float32) + wb_ref[...]
    o_ref[...] = y.astype(o_ref.dtype)


def _attention_kernel(qkv_ref, bias_ref, o_ref, *, n_head, d_head, scale):
    qkv = qkv_ref[0]                                                    # (S, 3D) f32
    bias = bias_ref[0]                                                  # (S, S)  f32
    d_model = n_head * d_head
    outs = []
    for hd in range(n_head):
        lo = hd * d_head
        q = qkv[:, lo:lo + d_head].astype(jnp.bfloat16)
        k = qkv[:, d_model + lo:d_model + lo + d_head].astype(jnp.bfloat16)
        v = qkv[:, 2 * d_model + lo:2 * d_model + lo + d_head].astype(jnp.bfloat16)
        s = jnp.dot(q, k.T, preferred_element_type=jnp.float32) * scale + bias
        m = jnp.max(s, axis=-1, keepdims=True)
        p = jnp.exp(s - m)
        denom = jnp.sum(p, axis=-1, keepdims=True)
        p = p * pl.reciprocal(denom, approx=True)
        outs.append(jnp.dot(p.astype(jnp.bfloat16), v,
                            preferred_element_type=jnp.float32))
    o_ref[0] = jnp.concatenate(outs, axis=-1).astype(o_ref.dtype)       # (S, D) single store


def _proj_residual_kernel(a_ref, w_ref, b_ref, h_ref, o_ref):
    y = jnp.dot(a_ref[...].astype(jnp.bfloat16), w_ref[...],
                preferred_element_type=jnp.float32) + b_ref[...]
    o_ref[...] = (h_ref[...] + y).astype(o_ref.dtype)


def _mlp_block_kernel(h_ref, g_ref, b_ref, fcw_ref, fcb_ref, pw_ref, pb_ref, o_ref, *, eps):
    h = h_ref[...]
    x = _ln(h, g_ref[...], b_ref[...], eps)
    u = jnp.dot(x.astype(jnp.bfloat16), fcw_ref[...],
                preferred_element_type=jnp.float32) + fcb_ref[...]
    u = _gelu(u)
    y = jnp.dot(u.astype(jnp.bfloat16), pw_ref[...],
                preferred_element_type=jnp.float32) + pb_ref[...]
    o_ref[...] = (h + y).astype(o_ref.dtype)


def _lnf_score_kernel(h_ref, g_ref, b_ref, w_ref, o_ref, *, eps):
    x = _ln(h_ref[...], g_ref[...], b_ref[...], eps)
    o_ref[...] = jnp.dot(x.astype(jnp.bfloat16), w_ref[...],
                         preferred_element_type=jnp.float32).astype(o_ref.dtype)


# --------------------------------- call wrappers ------------------------------------

_PAR = pltpu.CompilerParams(dimension_semantics=("parallel",))


def ln_qkv(h, g, b, w, wb, *, tm, eps=1e-5):
    M, D = h.shape
    N = w.shape[1]
    return pl.pallas_call(
        functools.partial(_ln_qkv_kernel, eps=eps),
        out_shape=jax.ShapeDtypeStruct((M, N), jnp.float32),
        grid=(M // tm,),
        in_specs=[
            pl.BlockSpec((tm, D), lambda i: (i, 0)),
            pl.BlockSpec((1, D), lambda i: (0, 0)),
            pl.BlockSpec((1, D), lambda i: (0, 0)),
            pl.BlockSpec((D, N), lambda i: (0, 0)),
            pl.BlockSpec((1, N), lambda i: (0, 0)),
        ],
        out_specs=pl.BlockSpec((tm, N), lambda i: (i, 0)),
        compiler_params=_PAR,
    )(h, g, b, w, wb)


def attention(qkv, attn_bias, *, n_head, d_head):
    B, S, threeD = qkv.shape
    D = n_head * d_head
    scale = 1.0 / math.sqrt(d_head)
    return pl.pallas_call(
        functools.partial(_attention_kernel, n_head=n_head, d_head=d_head, scale=scale),
        out_shape=jax.ShapeDtypeStruct((B, S, D), jnp.float32),
        grid=(B,),
        in_specs=[
            pl.BlockSpec((1, S, threeD), lambda bi: (bi, 0, 0)),
            pl.BlockSpec((1, S, S), lambda bi: (bi, 0, 0)),
        ],
        out_specs=pl.BlockSpec((1, S, D), lambda bi: (bi, 0, 0)),
        compiler_params=_PAR,
    )(qkv, attn_bias)


def proj_residual(a, w, b, h, *, tm):
    M, D = a.shape
    N = w.shape[1]
    return pl.pallas_call(
        _proj_residual_kernel,
        out_shape=jax.ShapeDtypeStruct((M, N), jnp.float32),
        grid=(M // tm,),
        in_specs=[
            pl.BlockSpec((tm, D), lambda i: (i, 0)),
            pl.BlockSpec((D, N), lambda i: (0, 0)),
            pl.BlockSpec((1, N), lambda i: (0, 0)),
            pl.BlockSpec((tm, N), lambda i: (i, 0)),
        ],
        out_specs=pl.BlockSpec((tm, N), lambda i: (i, 0)),
        compiler_params=_PAR,
    )(a, w, b, h)


def mlp_block(h, g, b, fcw, fcb, pw, pb, *, tm, eps=1e-5):
    M, D = h.shape
    Dff = fcw.shape[1]
    return pl.pallas_call(
        functools.partial(_mlp_block_kernel, eps=eps),
        out_shape=jax.ShapeDtypeStruct((M, D), jnp.float32),
        grid=(M // tm,),
        in_specs=[
            pl.BlockSpec((tm, D), lambda i: (i, 0)),
            pl.BlockSpec((1, D), lambda i: (0, 0)),
            pl.BlockSpec((1, D), lambda i: (0, 0)),
            pl.BlockSpec((D, Dff), lambda i: (0, 0)),
            pl.BlockSpec((1, Dff), lambda i: (0, 0)),
            pl.BlockSpec((Dff, D), lambda i: (0, 0)),
            pl.BlockSpec((1, D), lambda i: (0, 0)),
        ],
        out_specs=pl.BlockSpec((tm, D), lambda i: (i, 0)),
        compiler_params=_PAR,
    )(h, g, b, fcw, fcb, pw, pb)


def lnf_score(h, g, b, w, *, tm, eps=1e-5):
    M, D = h.shape
    N = w.shape[1]
    return pl.pallas_call(
        functools.partial(_lnf_score_kernel, eps=eps),
        out_shape=jax.ShapeDtypeStruct((M, N), jnp.float32),
        grid=(M // tm,),
        in_specs=[
            pl.BlockSpec((tm, D), lambda i: (i, 0)),
            pl.BlockSpec((1, D), lambda i: (0, 0)),
            pl.BlockSpec((1, D), lambda i: (0, 0)),
            pl.BlockSpec((D, N), lambda i: (0, 0)),
        ],
        out_specs=pl.BlockSpec((tm, N), lambda i: (i, 0)),
        compiler_params=_PAR,
    )(h, g, b, w)


# ------------------------------ parameter construction ------------------------------

def init_params(key, *, vocab, max_pos, d, n_layer, num_classes):
    # TODO(synk): GPT2ForSequenceClassification.from_pretrained() weights cannot be
    # loaded here; the backbone is deterministically random-initialized instead.
    std = 0.02
    keys = iter(jax.random.split(key, 8 + 8 * n_layer))

    def nrm(shape):
        return std * jax.random.normal(next(keys), shape, jnp.float32)

    n_pad = max(128, ((num_classes + 127) // 128) * 128)   # lane-dense score output
    score = nrm((d, num_classes))
    score_pad = jnp.zeros((d, n_pad), jnp.float32).at[:, :num_classes].set(score)

    p = {
        "wte": nrm((vocab, d)),
        "wpe": nrm((max_pos, d)),
        "blocks": [],
        "lnf_g": jnp.ones((1, d), jnp.float32),
        "lnf_b": jnp.zeros((1, d), jnp.float32),
        "score_w": score_pad.astype(jnp.bfloat16),          # (d, n_pad), bias=False
        "num_classes": num_classes,
    }
    for _ in range(n_layer):
        p["blocks"].append({
            "ln1_g": jnp.ones((1, d), jnp.float32), "ln1_b": jnp.zeros((1, d), jnp.float32),
            "attn_w": nrm((d, 3 * d)).astype(jnp.bfloat16),
            "attn_b": jnp.zeros((1, 3 * d), jnp.float32),
            "attn_proj_w": nrm((d, d)).astype(jnp.bfloat16),
            "attn_proj_b": jnp.zeros((1, d), jnp.float32),
            "ln2_g": jnp.ones((1, d), jnp.float32), "ln2_b": jnp.zeros((1, d), jnp.float32),
            "fc_w": nrm((d, 4 * d)).astype(jnp.bfloat16),
            "fc_b": jnp.zeros((1, 4 * d), jnp.float32),
            "proj_w": nrm((4 * d, d)).astype(jnp.bfloat16),
            "proj_b": jnp.zeros((1, d), jnp.float32),
        })
    return p


# ----------------------------------- forward pass -----------------------------------

def gpt2_classifier_forward(p, input_ids, attention_mask, *, n_head, num_classes):
    B, S = input_ids.shape
    D = p["wte"].shape[1]
    Dh = D // n_head
    M = B * S
    tm = _row_tile(M)

    # Embedding gather (plain-JAX glue), then flatten to a row-major (B*S, D) slab.
    h = (p["wte"][input_ids] + p["wpe"][jnp.arange(S)][None, :, :]).astype(jnp.float32)
    h = h.reshape(M, D)

    # Causal + key-padding masks folded ONCE into an additive bias, reused per layer/head.
    causal = jnp.tril(jnp.ones((S, S), jnp.float32))
    keep = causal[None, :, :] * attention_mask.astype(jnp.float32)[:, None, :]
    attn_bias = (1.0 - keep) * _NEG_INF                                  # (B, S, S)

    for blk in p["blocks"]:
        qkv = ln_qkv(h, blk["ln1_g"], blk["ln1_b"], blk["attn_w"], blk["attn_b"], tm=tm)
        a = attention(qkv.reshape(B, S, 3 * D), attn_bias, n_head=n_head, d_head=Dh)
        h = proj_residual(a.reshape(M, D), blk["attn_proj_w"], blk["attn_proj_b"], h, tm=tm)
        h = mlp_block(h, blk["ln2_g"], blk["ln2_b"], blk["fc_w"], blk["fc_b"],
                      blk["proj_w"], blk["proj_b"], tm=tm)

    token_logits = lnf_score(h, p["lnf_g"], p["lnf_b"], p["score_w"], tm=tm)  # (M, n_pad)
    token_logits = token_logits.reshape(B, S, -1)[:, :, :num_classes]         # (B, S, C)

    # GPT2ForSequenceClassification pooling: take logits at the last non-pad token
    # (pads are at the end, so attention_mask.sum-1 equals the HF pad_token_id scan).
    last = jnp.clip(jnp.sum(attention_mask, axis=-1).astype(jnp.int32) - 1, 0, S - 1)
    return token_logits[jnp.arange(B), last]                                  # (B, C)


# ---------------------------------------- main ---------------------------------------

if __name__ == "__main__":
    B, S = 2, 8                     # batch, sequence length
    D, n_head, n_layer = 32, 4, 2   # mini GPT-2 config (n_embd, heads, layers)
    vocab = 64
    num_classes = 2                 # config.num_labels = 2

    key = jax.random.PRNGKey(0)
    pkey, ikey = jax.random.split(key)
    params = init_params(pkey, vocab=vocab, max_pos=S, d=D, n_layer=n_layer,
                         num_classes=num_classes)

    input_ids = jax.random.randint(ikey, (B, S), 0, vocab, dtype=jnp.int32)
    attention_mask = jnp.array([[1, 1, 1, 1, 1, 1, 1, 1],
                                [1, 1, 1, 1, 1, 1, 0, 0]], dtype=jnp.int32)

    fwd = jax.jit(functools.partial(gpt2_classifier_forward,
                                    n_head=n_head, num_classes=num_classes))
    logits = fwd(params, input_ids, attention_mask)
    jax.block_until_ready(logits)

    assert logits.shape == (B, num_classes), logits.shape
    assert bool(jnp.all(jnp.isfinite(logits)))
    print("KERNEL_OK")
</pallas_src>

<mosaic_0001>
module attributes {stable_mosaic.version = 11 : i64} {
  func.func @_ln_qkv_kernel(%arg0: i32, %arg1: memref<8x32xf32, #tpu.memory_space<vmem>>, %arg2: memref<1x32xf32, #tpu.memory_space<vmem>>, %arg3: memref<1x32xf32, #tpu.memory_space<vmem>>, %arg4: memref<32x96xbf16, #tpu.memory_space<vmem>>, %arg5: memref<1x96xf32, #tpu.memory_space<vmem>>, %arg6: memref<8x96xf32, #tpu.memory_space<vmem>>) attributes {dimension_semantics = [#tpu.dimension_semantics<parallel>], iteration_bounds = array<i64: 2>, scalar_prefetch = 0 : i64, scratch_operands = 0 : i64, tpu.core_type = #tpu.core_type<tc>, window_params = [{transform_indices = @transform_0, window_bounds = array<i64: 8, 32>}, {pipeline_mode = #tpu.pipeline_mode<synchronous>, transform_indices = @transform_1, window_bounds = array<i64: 1, 32>}, {pipeline_mode = #tpu.pipeline_mode<synchronous>, transform_indices = @transform_2, window_bounds = array<i64: 1, 32>}, {pipeline_mode = #tpu.pipeline_mode<synchronous>, transform_indices = @transform_3, window_bounds = array<i64: 32, 96>}, {pipeline_mode = #tpu.pipeline_mode<synchronous>, transform_indices = @transform_4, window_bounds = array<i64: 1, 96>}, {transform_indices = @transform_5, window_bounds = array<i64: 8, 96>}]} {
    %c0 = arith.constant 0 : index
    %c0_0 = arith.constant 0 : index
    %0 = vector.load %arg1[%c0, %c0_0] : memref<8x32xf32, #tpu.memory_space<vmem>>, vector<8x32xf32>
    %c0_1 = arith.constant 0 : index
    %c0_2 = arith.constant 0 : index
    %1 = vector.load %arg2[%c0_1, %c0_2] : memref<1x32xf32, #tpu.memory_space<vmem>>, vector<1x32xf32>
    %c0_3 = arith.constant 0 : index
    %c0_4 = arith.constant 0 : index
    %2 = vector.load %arg3[%c0_3, %c0_4] : memref<1x32xf32, #tpu.memory_space<vmem>>, vector<1x32xf32>
    %cst = arith.constant dense<0.000000e+00> : vector<8xf32>
    %3 = vector.multi_reduction <add>, %0, %cst [1] : vector<8x32xf32> to vector<8xf32>
    %4 = vector.shape_cast %3 : vector<8xf32> to vector<8x1xf32>
    %cst_5 = arith.constant 3.200000e+01 : f32
    %5 = vector.broadcast %cst_5 : f32 to vector<8x1xf32>
    %6 = arith.divf %4, %5 : vector<8x1xf32>
    %7 = vector.broadcast %6 : vector<8x1xf32> to vector<8x32xf32>
    %8 = arith.subf %0, %7 : vector<8x32xf32>
    %9 = arith.mulf %8, %8 : vector<8x32xf32>
    %cst_6 = arith.constant dense<0.000000e+00> : vector<8xf32>
    %10 = vector.multi_reduction <add>, %9, %cst_6 [1] : vector<8x32xf32> to vector<8xf32>
    %11 = vector.shape_cast %10 : vector<8xf32> to vector<8x1xf32>
    %cst_7 = arith.constant 3.200000e+01 : f32
    %12 = vector.broadcast %cst_7 : f32 to vector<8x1xf32>
    %13 = arith.divf %11, %12 : vector<8x1xf32>
    %14 = vector.broadcast %6 : vector<8x1xf32> to vector<8x32xf32>
    %15 = arith.subf %0, %14 : vector<8x32xf32>
    %cst_8 = arith.constant 9.99999974E-6 : f32
    %16 = vector.broadcast %cst_8 : f32 to vector<8x1xf32>
    %17 = arith.addf %13, %16 : vector<8x1xf32>
    %18 = math.rsqrt %17 : vector<8x1xf32>
    %19 = vector.broadcast %18 : vector<8x1xf32> to vector<8x32xf32>
    %20 = arith.mulf %15, %19 : vector<8x32xf32>
    %21 = vector.broadcast %1 : vector<1x32xf32> to vector<8x32xf32>
    %22 = arith.mulf %20, %21 : vector<8x32xf32>
    %23 = vector.broadcast %2 : vector<1x32xf32> to vector<8x32xf32>
    %24 = arith.addf %22, %23 : vector<8x32xf32>
    %25 = arith.truncf %24 : vector<8x32xf32> to vector<8x32xbf16>
    %c0_9 = arith.constant 0 : index
    %c0_10 = arith.constant 0 : index
    %26 = vector.load %arg4[%c0_9, %c0_10] : memref<32x96xbf16, #tpu.memory_space<vmem>>, vector<32x96xbf16>
    %cst_11 = arith.constant dense<0.000000e+00> : vector<8x96xf32>
    %27 = tpu.matmul %25, %26, %cst_11 {dimension_numbers = #tpu.dot_dimension_numbers<[1], [0], [0], [1], [0, 0, 1, 1], [], []>} : vector<8x32xbf16>, vector<32x96xbf16>, vector<8x96xf32> -> vector<8x96xf32>
    %c0_12 = arith.constant 0 : index
    %c0_13 = arith.constant 0 : index
    %28 = vector.load %arg5[%c0_12, %c0_13] : memref<1x96xf32, #tpu.memory_space<vmem>>, vector<1x96xf32>
    %29 = vector.broadcast %28 : vector<1x96xf32> to vector<8x96xf32>
    %30 = arith.addf %27, %29 : vector<8x96xf32>
    %c0_14 = arith.constant 0 : index
    %c0_15 = arith.constant 0 : index
    %31 = vector.load %arg6[%c0_14, %c0_15] : memref<8x96xf32, #tpu.memory_space<vmem>>, vector<8x96xf32>
    tpu.vector_store %arg6[%c0_14, %c0_15], %30 {strides = array<i32>} : memref<8x96xf32, #tpu.memory_space<vmem>>, vector<8x96xf32>,
    return
  }
  func.func @transform_0(%arg0: i32) -> (i32, i32) {
    %c0_i32 = arith.constant 0 : i32
    %c0_i32_0 = arith.constant 0 : i32
    return %arg0, %c0_i32 : i32, i32
  }
  func.func @transform_1(%arg0: i32) -> (i32, i32) {
    %c0_i32 = arith.constant 0 : i32
    %c0_i32_0 = arith.constant 0 : i32
    %c0_i32_1 = arith.constant 0 : i32
    return %c0_i32, %c0_i32_0 : i32, i32
  }
  func.func @transform_2(%arg0: i32) -> (i32, i32) {
    %c0_i32 = arith.constant 0 : i32
    %c0_i32_0 = arith.constant 0 : i32
    %c0_i32_1 = arith.constant 0 : i32
    return %c0_i32, %c0_i32_0 : i32, i32
  }
  func.func @transform_3(%arg0: i32) -> (i32, i32) {
    %c0_i32 = arith.constant 0 : i32
    %c0_i32_0 = arith.constant 0 : i32
    %c0_i32_1 = arith.constant 0 : i32
    return %c0_i32, %c0_i32_0 : i32, i32
  }
  func.func @transform_4(%arg0: i32) -> (i32, i32) {
    %c0_i32 = arith.constant 0 : i32
    %c0_i32_0 = arith.constant 0 : i32
    %c0_i32_1 = arith.constant 0 : i32
    return %c0_i32, %c0_i32_0 : i32, i32
  }
  func.func @transform_5(%arg0: i32) -> (i32, i32) {
    %c0_i32 = arith.constant 0 : i32
    %c0_i32_0 = arith.constant 0 : i32
    return %arg0, %c0_i32 : i32, i32
  }
}

module attributes {stable_mosaic.version = 11 : i64} {
  func.func @_proj_residual_kernel(%arg0: i32, %arg1: memref<8x32xf32, #tpu.memory_space<vmem>>, %arg2: memref<32x32xbf16, #tpu.memory_space<vmem>>, %arg3: memref<1x32xf32, #tpu.memory_space<vmem>>, %arg4: memref<8x32xf32, #tpu.memory_space<vmem>>, %arg5: memref<8x32xf32, #tpu.memory_space<vmem>>) attributes {dimension_semantics = [#tpu.dimension_semantics<parallel>], iteration_bounds = array<i64: 2>, scalar_prefetch = 0 : i64, scratch_operands = 0 : i64, tpu.core_type = #tpu.core_type<tc>, window_params = [{transform_indices = @transform_0, window_bounds = array<i64: 8, 32>}, {pipeline_mode = #tpu.pipeline_mode<synchronous>, transform_indices = @transform_1, window_bounds = array<i64: 32, 32>}, {pipeline_mode = #tpu.pipeline_mode<synchronous>, transform_indices = @transform_2, window_bounds = array<i64: 1, 32>}, {transform_indices = @transform_3, window_bounds = array<i64: 8, 32>}, {transform_indices = @transform_4, window_bounds = array<i64: 8, 32>}]} {
    %c0 = arith.constant 0 : index
    %c0_0 = arith.constant 0 : index
    %0 = vector.load %arg1[%c0, %c0_0] : memref<8x32xf32, #tpu.memory_space<vmem>>, vector<8x32xf32>
    %1 = arith.truncf %0 : vector<8x32xf32> to vector<8x32xbf16>
    %c0_1 = arith.constant 0 : index
    %c0_2 = arith.constant 0 : index
    %2 = vector.load %arg2[%c0_1, %c0_2] : memref<32x32xbf16, #tpu.memory_space<vmem>>, vector<32x32xbf16>
    %cst = arith.constant dense<0.000000e+00> : vector<8x32xf32>
    %3 = tpu.matmul %1, %2, %cst {dimension_numbers = #tpu.dot_dimension_numbers<[1], [0], [0], [1], [0, 0, 1, 1], [], []>} : vector<8x32xbf16>, vector<32x32xbf16>, vector<8x32xf32> -> vector<8x32xf32>
    %c0_3 = arith.constant 0 : index
    %c0_4 = arith.constant 0 : index
    %4 = vector.load %arg3[%c0_3, %c0_4] : memref<1x32xf32, #tpu.memory_space<vmem>>, vector<1x32xf32>
    %5 = vector.broadcast %4 : vector<1x32xf32> to vector<8x32xf32>
    %6 = arith.addf %3, %5 : vector<8x32xf32>
    %c0_5 = arith.constant 0 : index
    %c0_6 = arith.constant 0 : index
    %7 = vector.load %arg4[%c0_5, %c0_6] : memref<8x32xf32, #tpu.memory_space<vmem>>, vector<8x32xf32>
    %8 = arith.addf %7, %6 : vector<8x32xf32>
    %c0_7 = arith.constant 0 : index
    %c0_8 = arith.constant 0 : index
    %9 = vector.load %arg5[%c0_7, %c0_8] : memref<8x32xf32, #tpu.memory_space<vmem>>, vector<8x32xf32>
    tpu.vector_store %arg5[%c0_7, %c0_8], %8 {strides = array<i32>} : memref<8x32xf32, #tpu.memory_space<vmem>>, vector<8x32xf32>,
    return
  }
  func.func @transform_0(%arg0: i32) -> (i32, i32) {
    %c0_i32 = arith.constant 0 : i32
    %c0_i32_0 = arith.constant 0 : i32
    return %arg0, %c0_i32 : i32, i32
  }
  func.func @transform_1(%arg0: i32) -> (i32, i32) {
    %c0_i32 = arith.constant 0 : i32
    %c0_i32_0 = arith.constant 0 : i32
    %c0_i32_1 = arith.constant 0 : i32
    return %c0_i32, %c0_i32_0 : i32, i32
  }
  func.func @transform_2(%arg0: i32) -> (i32, i32) {
    %c0_i32 = arith.constant 0 : i32
    %c0_i32_0 = arith.constant 0 : i32
    %c0_i32_1 = arith.constant 0 : i32
    return %c0_i32, %c0_i32_0 : i32, i32
  }
  func.func @transform_3(%arg0: i32) -> (i32, i32) {
    %c0_i32 = arith.constant 0 : i32
    %c0_i32_0 = arith.constant 0 : i32
    return %arg0, %c0_i32 : i32, i32
  }
  func.func @transform_4(%arg0: i32) -> (i32, i32) {
    %c0_i32 = arith.constant 0 : i32
    %c0_i32_0 = arith.constant 0 : i32
    return %arg0, %c0_i32 : i32, i32
  }
}

module attributes {stable_mosaic.version = 11 : i64} {
  func.func @_attention_kernel(%arg0: i32, %arg1: memref<1x8x96xf32, #tpu.memory_space<vmem>>, %arg2: memref<1x8x8xf32, #tpu.memory_space<vmem>>, %arg3: memref<1x8x32xf32, #tpu.memory_space<vmem>>) attributes {dimension_semantics = [#tpu.dimension_semantics<parallel>], iteration_bounds = array<i64: 2>, scalar_prefetch = 0 : i64, scratch_operands = 0 : i64, tpu.core_type = #tpu.core_type<tc>, window_params = [{transform_indices = @transform_0, window_bounds = array<i64: 1, 8, 96>}, {transform_indices = @transform_1, window_bounds = array<i64: 1, 8, 8>}, {transform_indices = @transform_2, window_bounds = array<i64: 1, 8, 32>}]} {
    %c0 = arith.constant 0 : index
    %c0_0 = arith.constant 0 : index
    %c0_1 = arith.constant 0 : index
    %0 = vector.load %arg1[%c0, %c0_0, %c0_1] : memref<1x8x96xf32, #tpu.memory_space<vmem>>, vector<1x8x96xf32>
    %1 = vector.shape_cast %0 : vector<1x8x96xf32> to vector<8x96xf32>
    %c0_2 = arith.constant 0 : index
    %c0_3 = arith.constant 0 : index
    %c0_4 = arith.constant 0 : index
    %2 = vector.load %arg2[%c0_2, %c0_3, %c0_4] : memref<1x8x8xf32, #tpu.memory_space<vmem>>, vector<1x8x8xf32>
    %3 = vector.shape_cast %2 : vector<1x8x8xf32> to vector<8x8xf32>
    %4 = vector.extract_strided_slice %1 {offsets = [0, 0], sizes = [8, 8], strides = [1, 1]} : vector<8x96xf32> to vector<8x8xf32>
    %5 = arith.truncf %4 : vector<8x8xf32> to vector<8x8xbf16>
    %6 = vector.extract_strided_slice %1 {offsets = [0, 32], sizes = [8, 8], strides = [1, 1]} : vector<8x96xf32> to vector<8x8xf32>
    %7 = arith.truncf %6 : vector<8x8xf32> to vector<8x8xbf16>
    %8 = vector.extract_strided_slice %1 {offsets = [0, 64], sizes = [8, 8], strides = [1, 1]} : vector<8x96xf32> to vector<8x8xf32>
    %9 = arith.truncf %8 : vector<8x8xf32> to vector<8x8xbf16>
    %10 = tpu.transpose %7, [1, 0] : vector<8x8xbf16> -> vector<8x8xbf16>
    %cst = arith.constant dense<0.000000e+00> : vector<8x8xf32>
    %11 = tpu.matmul %5, %10, %cst {dimension_numbers = #tpu.dot_dimension_numbers<[1], [0], [0], [1], [0, 0, 1, 1], [], []>} : vector<8x8xbf16>, vector<8x8xbf16>, vector<8x8xf32> -> vector<8x8xf32>
    %cst_5 = arith.constant 0.353553385 : f32
    %12 = vector.broadcast %cst_5 : f32 to vector<8x8xf32>
    %13 = arith.mulf %11, %12 : vector<8x8xf32>
    %14 = arith.addf %13, %3 : vector<8x8xf32>
    %cst_6 = arith.constant dense<0xFF800000> : vector<8xf32>
    %15 = vector.multi_reduction <maximumf>, %14, %cst_6 [1] : vector<8x8xf32> to vector<8xf32>
    %16 = vector.shape_cast %15 : vector<8xf32> to vector<8x1xf32>
    %17 = vector.broadcast %16 : vector<8x1xf32> to vector<8x8xf32>
    %18 = arith.subf %14, %17 : vector<8x8xf32>
    %19 = math.exp %18 : vector<8x8xf32>
    %cst_7 = arith.constant dense<0.000000e+00> : vector<8xf32>
    %20 = vector.multi_reduction <add>, %19, %cst_7 [1] : vector<8x8xf32> to vector<8xf32>
    %21 = vector.shape_cast %20 : vector<8xf32> to vector<8x1xf32>
    %22 = tpu.reciprocal %21 {approx = true} : vector<8x1xf32> -> vector<8x1xf32>
    %23 = vector.broadcast %22 : vector<8x1xf32> to vector<8x8xf32>
    %24 = arith.mulf %19, %23 : vector<8x8xf32>
    %25 = arith.truncf %24 : vector<8x8xf32> to vector<8x8xbf16>
    %cst_8 = arith.constant dense<0.000000e+00> : vector<8x8xf32>
    %26 = tpu.matmul %25, %9, %cst_8 {dimension_numbers = #tpu.dot_dimension_numbers<[1], [0], [0], [1], [0, 0, 1, 1], [], []>} : vector<8x8xbf16>, vector<8x8xbf16>, vector<8x8xf32> -> vector<8x8xf32>
    %27 = vector.extract_strided_slice %1 {offsets = [0, 8], sizes = [8, 8], strides = [1, 1]} : vector<8x96xf32> to vector<8x8xf32>
    %28 = arith.truncf %27 : vector<8x8xf32> to vector<8x8xbf16>
    %29 = vector.extract_strided_slice %1 {offsets = [0, 40], sizes = [8, 8], strides = [1, 1]} : vector<8x96xf32> to vector<8x8xf32>
    %30 = arith.truncf %29 : vector<8x8xf32> to vector<8x8xbf16>
    %31 = vector.extract_strided_slice %1 {offsets = [0, 72], sizes = [8, 8], strides = [1, 1]} : vector<8x96xf32> to vector<8x8xf32>
    %32 = arith.truncf %31 : vector<8x8xf32> to vector<8x8xbf16>
    %33 = tpu.transpose %30, [1, 0] : vector<8x8xbf16> -> vector<8x8xbf16>
    %cst_9 = arith.constant dense<0.000000e+00> : vector<8x8xf32>
    %34 = tpu.matmul %28, %33, %cst_9 {dimension_numbers = #tpu.dot_dimension_numbers<[1], [0], [0], [1], [0, 0, 1, 1], [], []>} : vector<8x8xbf16>, vector<8x8xbf16>, vector<8x8xf32> -> vector<8x8xf32>
    %cst_10 = arith.constant 0.353553385 : f32
    %35 = vector.broadcast %cst_10 : f32 to vector<8x8xf32>
    %36 = arith.mulf %34, %35 : vector<8x8xf32>
    %37 = arith.addf %36, %3 : vector<8x8xf32>
    %cst_11 = arith.constant dense<0xFF800000> : vector<8xf32>
    %38 = vector.multi_reduction <maximumf>, %37, %cst_11 [1] : vector<8x8xf32> to vector<8xf32>
    %39 = vector.shape_cast %38 : vector<8xf32> to vector<8x1xf32>
    %40 = vector.broadcast %39 : vector<8x1xf32> to vector<8x8xf32>
    %41 = arith.subf %37, %40 : vector<8x8xf32>
    %42 = math.exp %41 : vector<8x8xf32>
    %cst_12 = arith.constant dense<0.000000e+00> : vector<8xf32>
    %43 = vector.multi_reduction <add>, %42, %cst_12 [1] : vector<8x8xf32> to vector<8xf32>
    %44 = vector.shape_cast %43 : vector<8xf32> to vector<8x1xf32>
    %45 = tpu.reciprocal %44 {approx = true} : vector<8x1xf32> -> vector<8x1xf32>
    %46 = vector.broadcast %45 : vector<8x1xf32> to vector<8x8xf32>
    %47 = arith.mulf %42, %46 : vector<8x8xf32>
    %48 = arith.truncf %47 : vector<8x8xf32> to vector<8x8xbf16>
    %cst_13 = arith.constant dense<0.000000e+00> : vector<8x8xf32>
    %49 = tpu.matmul %48, %32, %cst_13 {dimension_numbers = #tpu.dot_dimension_numbers<[1], [0], [0], [1], [0, 0, 1, 1], [], []>} : vector<8x8xbf16>, vector<8x8xbf16>, vector<8x8xf32> -> vector<8x8xf32>
    %50 = vector.extract_strided_slice %1 {offsets = [0, 16], sizes = [8, 8], strides = [1, 1]} : vector<8x96xf32> to vector<8x8xf32>
    %51 = arith.truncf %50 : vector<8x8xf32> to vector<8x8xbf16>
    %52 = vector.extract_strided_slice %1 {offsets = [0, 48], sizes = [8, 8], strides = [1, 1]} : vector<8x96xf32> to vector<8x8xf32>
    %53 = arith.truncf %52 : vector<8x8xf32> to vector<8x8xbf16>
    %54 = vector.extract_strided_slice %1 {offsets = [0, 80], sizes = [8, 8], strides = [1, 1]} : vector<8x96xf32> to vector<8x8xf32>
    %55 = arith.truncf %54 : vector<8x8xf32> to vector<8x8xbf16>
    %56 = tpu.transpose %53, [1, 0] : vector<8x8xbf16> -> vector<8x8xbf16>
    %cst_14 = arith.constant dense<0.000000e+00> : vector<8x8xf32>
    %57 = tpu.matmul %51, %56, %cst_14 {dimension_numbers = #tpu.dot_dimension_numbers<[1], [0], [0], [1], [0, 0, 1, 1], [], []>} : vector<8x8xbf16>, vector<8x8xbf16>, vector<8x8xf32> -> vector<8x8xf32>
    %cst_15 = arith.constant 0.353553385 : f32
    %58 = vector.broadcast %cst_15 : f32 to vector<8x8xf32>
    %59 = arith.mulf %57, %58 : vector<8x8xf32>
    %60 = arith.addf %59, %3 : vector<8x8xf32>
    %cst_16 = arith.constant dense<0xFF800000> : vector<8xf32>
    %61 = vector.multi_reduction <maximumf>, %60, %cst_16 [1] : vector<8x8xf32> to vector<8xf32>
    %62 = vector.shape_cast %61 : vector<8xf32> to vector<8x1xf32>
    %63 = vector.broadcast %62 : vector<8x1xf32> to vector<8x8xf32>
    %64 = arith.subf %60, %63 : vector<8x8xf32>
    %65 = math.exp %64 : vector<8x8xf32>
    %cst_17 = arith.constant dense<0.000000e+00> : vector<8xf32>
    %66 = vector.multi_reduction <add>, %65, %cst_17 [1] : vector<8x8xf32> to vector<8xf32>
    %67 = vector.shape_cast %66 : vector<8xf32> to vector<8x1xf32>
    %68 = tpu.reciprocal %67 {approx = true} : vector<8x1xf32> -> vector<8x1xf32>
    %69 = vector.broadcast %68 : vector<8x1xf32> to vector<8x8xf32>
    %70 = arith.mulf %65, %69 : vector<8x8xf32>
    %71 = arith.truncf %70 : vector<8x8xf32> to vector<8x8xbf16>
    %cst_18 = arith.constant dense<0.000000e+00> : vector<8x8xf32>
    %72 = tpu.matmul %71, %55, %cst_18 {dimension_numbers = #tpu.dot_dimension_numbers<[1], [0], [0], [1], [0, 0, 1, 1], [], []>} : vector<8x8xbf16>, vector<8x8xbf16>, vector<8x8xf32> -> vector<8x8xf32>
    %73 = vector.extract_strided_slice %1 {offsets = [0, 24], sizes = [8, 8], strides = [1, 1]} : vector<8x96xf32> to vector<8x8xf32>
    %74 = arith.truncf %73 : vector<8x8xf32> to vector<8x8xbf16>
    %75 = vector.extract_strided_slice %1 {offsets = [0, 56], sizes = [8, 8], strides = [1, 1]} : vector<8x96xf32> to vector<8x8xf32>
    %76 = arith.truncf %75 : vector<8x8xf32> to vector<8x8xbf16>
    %77 = vector.extract_strided_slice %1 {offsets = [0, 88], sizes = [8, 8], strides = [1, 1]} : vector<8x96xf32> to vector<8x8xf32>
    %78 = arith.truncf %77 : vector<8x8xf32> to vector<8x8xbf16>
    %79 = tpu.transpose %76, [1, 0] : vector<8x8xbf16> -> vector<8x8xbf16>
    %cst_19 = arith.constant dense<0.000000e+00> : vector<8x8xf32>
    %80 = tpu.matmul %74, %79, %cst_19 {dimension_numbers = #tpu.dot_dimension_numbers<[1], [0], [0], [1], [0, 0, 1, 1], [], []>} : vector<8x8xbf16>, vector<8x8xbf16>, vector<8x8xf32> -> vector<8x8xf32>
    %cst_20 = arith.constant 0.353553385 : f32
    %81 = vector.broadcast %cst_20 : f32 to vector<8x8xf32>
    %82 = arith.mulf %80, %81 : vector<8x8xf32>
    %83 = arith.addf %82, %3 : vector<8x8xf32>
    %cst_21 = arith.constant dense<0xFF800000> : vector<8xf32>
    %84 = vector.multi_reduction <maximumf>, %83, %cst_21 [1] : vector<8x8xf32> to vector<8xf32>
    %85 = vector.shape_cast %84 : vector<8xf32> to vector<8x1xf32>
    %86 = vector.broadcast %85 : vector<8x1xf32> to vector<8x8xf32>
    %87 = arith.subf %83, %86 : vector<8x8xf32>
    %88 = math.exp %87 : vector<8x8xf32>
    %cst_22 = arith.constant dense<0.000000e+00> : vector<8xf32>
    %89 = vector.multi_reduction <add>, %88, %cst_22 [1] : vector<8x8xf32> to vector<8xf32>
    %90 = vector.shape_cast %89 : vector<8xf32> to vector<8x1xf32>
    %91 = tpu.reciprocal %90 {approx = true} : vector<8x1xf32> -> vector<8x1xf32>
    %92 = vector.broadcast %91 : vector<8x1xf32> to vector<8x8xf32>
    %93 = arith.mulf %88, %92 : vector<8x8xf32>
    %94 = arith.truncf %93 : vector<8x8xf32> to vector<8x8xbf16>
    %cst_23 = arith.constant dense<0.000000e+00> : vector<8x8xf32>
    %95 = tpu.matmul %94, %78, %cst_23 {dimension_numbers = #tpu.dot_dimension_numbers<[1], [0], [0], [1], [0, 0, 1, 1], [], []>} : vector<8x8xbf16>, vector<8x8xbf16>, vector<8x8xf32> -> vector<8x8xf32>
    %96 = tpu.concatenate %26, %49, %72, %95 in 1 : vector<8x8xf32>, vector<8x8xf32>, vector<8x8xf32>, vector<8x8xf32> -> vector<8x32xf32>
    %c0_24 = arith.constant 0 : index
    %c0_25 = arith.constant 0 : index
    %c0_26 = arith.constant 0 : index
    %97 = vector.load %arg3[%c0_24, %c0_25, %c0_26] : memref<1x8x32xf32, #tpu.memory_space<vmem>>, vector<1x8x32xf32>
    %98 = vector.shape_cast %97 : vector<1x8x32xf32> to vector<8x32xf32>
    %99 = vector.shape_cast %96 : vector<8x32xf32> to vector<1x8x32xf32>
    tpu.vector_store %arg3[%c0_24, %c0_25, %c0_26], %99 {strides = array<i32>} : memref<1x8x32xf32, #tpu.memory_space<vmem>>, vector<1x8x32xf32>,
    return
  }
  func.func @transform_0(%arg0: i32) -> (i32, i32, i32) {
    %c0_i32 = arith.constant 0 : i32
    %c0_i32_0 = arith.constant 0 : i32
    %c0_i32_1 = arith.constant 0 : i32
    return %arg0, %c0_i32, %c0_i32_0 : i32, i32, i32
  }
  func.func @transform_1(%arg0: i32) -> (i32, i32, i32) {
    %c0_i32 = arith.constant 0 : i32
    %c0_i32_0 = arith.constant 0 : i32
    %c0_i32_1 = arith.constant 0 : i32
    return %arg0, %c0_i32, %c0_i32_0 : i32, i32, i32
  }
  func.func @transform_2(%arg0: i32) -> (i32, i32, i32) {
    %c0_i32 = arith.constant 0 : i32
    %c0_i32_0 = arith.constant 0 : i32
    %c0_i32_1 = arith.constant 0 : i32
    return %arg0, %c0_i32, %c0_i32_0 : i32, i32, i32
  }
}

module attributes {stable_mosaic.version = 11 : i64} {
  func.func @_mlp_block_kernel(%arg0: i32, %arg1: memref<8x32xf32, #tpu.memory_space<vmem>>, %arg2: memref<1x32xf32, #tpu.memory_space<vmem>>, %arg3: memref<1x32xf32, #tpu.memory_space<vmem>>, %arg4: memref<32x128xbf16, #tpu.memory_space<vmem>>, %arg5: memref<1x128xf32, #tpu.memory_space<vmem>>, %arg6: memref<128x32xbf16, #tpu.memory_space<vmem>>, %arg7: memref<1x32xf32, #tpu.memory_space<vmem>>, %arg8: memref<8x32xf32, #tpu.memory_space<vmem>>) attributes {dimension_semantics = [#tpu.dimension_semantics<parallel>], iteration_bounds = array<i64: 2>, scalar_prefetch = 0 : i64, scratch_operands = 0 : i64, tpu.core_type = #tpu.core_type<tc>, window_params = [{transform_indices = @transform_0, window_bounds = array<i64: 8, 32>}, {pipeline_mode = #tpu.pipeline_mode<synchronous>, transform_indices = @transform_1, window_bounds = array<i64: 1, 32>}, {pipeline_mode = #tpu.pipeline_mode<synchronous>, transform_indices = @transform_2, window_bounds = array<i64: 1, 32>}, {pipeline_mode = #tpu.pipeline_mode<synchronous>, transform_indices = @transform_3, window_bounds = array<i64: 32, 128>}, {pipeline_mode = #tpu.pipeline_mode<synchronous>, transform_indices = @transform_4, window_bounds = array<i64: 1, 128>}, {pipeline_mode = #tpu.pipeline_mode<synchronous>, transform_indices = @transform_5, window_bounds = array<i64: 128, 32>}, {pipeline_mode = #tpu.pipeline_mode<synchronous>, transform_indices = @transform_6, window_bounds = array<i64: 1, 32>}, {transform_indices = @transform_7, window_bounds = array<i64: 8, 32>}]} {
    %c0 = arith.constant 0 : index
    %c0_0 = arith.constant 0 : index
    %0 = vector.load %arg1[%c0, %c0_0] : memref<8x32xf32, #tpu.memory_space<vmem>>, vector<8x32xf32>
    %c0_1 = arith.constant 0 : index
    %c0_2 = arith.constant 0 : index
    %1 = vector.load %arg2[%c0_1, %c0_2] : memref<1x32xf32, #tpu.memory_space<vmem>>, vector<1x32xf32>
    %c0_3 = arith.constant 0 : index
    %c0_4 = arith.constant 0 : index
    %2 = vector.load %arg3[%c0_3, %c0_4] : memref<1x32xf32, #tpu.memory_space<vmem>>, vector<1x32xf32>
    %cst = arith.constant dense<0.000000e+00> : vector<8xf32>
    %3 = vector.multi_reduction <add>, %0, %cst [1] : vector<8x32xf32> to vector<8xf32>
    %4 = vector.shape_cast %3 : vector<8xf32> to vector<8x1xf32>
    %cst_5 = arith.constant 3.200000e+01 : f32
    %5 = vector.broadcast %cst_5 : f32 to vector<8x1xf32>
    %6 = arith.divf %4, %5 : vector<8x1xf32>
    %7 = vector.broadcast %6 : vector<8x1xf32> to vector<8x32xf32>
    %8 = arith.subf %0, %7 : vector<8x32xf32>
    %9 = arith.mulf %8, %8 : vector<8x32xf32>
    %cst_6 = arith.constant dense<0.000000e+00> : vector<8xf32>
    %10 = vector.multi_reduction <add>, %9, %cst_6 [1] : vector<8x32xf32> to vector<8xf32>
    %11 = vector.shape_cast %10 : vector<8xf32> to vector<8x1xf32>
    %cst_7 = arith.constant 3.200000e+01 : f32
    %12 = vector.broadcast %cst_7 : f32 to vector<8x1xf32>
    %13 = arith.divf %11, %12 : vector<8x1xf32>
    %14 = vector.broadcast %6 : vector<8x1xf32> to vector<8x32xf32>
    %15 = arith.subf %0, %14 : vector<8x32xf32>
    %cst_8 = arith.constant 9.99999974E-6 : f32
    %16 = vector.broadcast %cst_8 : f32 to vector<8x1xf32>
    %17 = arith.addf %13, %16 : vector<8x1xf32>
    %18 = math.rsqrt %17 : vector<8x1xf32>
    %19 = vector.broadcast %18 : vector<8x1xf32> to vector<8x32xf32>
    %20 = arith.mulf %15, %19 : vector<8x32xf32>
    %21 = vector.broadcast %1 : vector<1x32xf32> to vector<8x32xf32>
    %22 = arith.mulf %20, %21 : vector<8x32xf32>
    %23 = vector.broadcast %2 : vector<1x32xf32> to vector<8x32xf32>
    %24 = arith.addf %22, %23 : vector<8x32xf32>
    %25 = arith.truncf %24 : vector<8x32xf32> to vector<8x32xbf16>
    %c0_9 = arith.constant 0 : index
    %c0_10 = arith.constant 0 : index
    %26 = vector.load %arg4[%c0_9, %c0_10] : memref<32x128xbf16, #tpu.memory_space<vmem>>, vector<32x128xbf16>
    %cst_11 = arith.constant dense<0.000000e+00> : vector<8x128xf32>
    %27 = tpu.matmul %25, %26, %cst_11 {dimension_numbers = #tpu.dot_dimension_numbers<[1], [0], [0], [1], [0, 0, 1, 1], [], []>} : vector<8x32xbf16>, vector<32x128xbf16>, vector<8x128xf32> -> vector<8x128xf32>
    %c0_12 = arith.constant 0 : index
    %c0_13 = arith.constant 0 : index
    %28 = vector.load %arg5[%c0_12, %c0_13] : memref<1x128xf32, #tpu.memory_space<vmem>>, vector<1x128xf32>
    %29 = vector.broadcast %28 : vector<1x128xf32> to vector<8x128xf32>
    %30 = arith.addf %27, %29 : vector<8x128xf32>
    %cst_14 = arith.constant 5.000000e-01 : f32
    %31 = vector.broadcast %cst_14 : f32 to vector<8x128xf32>
    %32 = arith.mulf %31, %30 : vector<8x128xf32>
    %cst_15 = arith.constant 4.471500e-02 : f32
    %33 = vector.broadcast %cst_15 : f32 to vector<8x128xf32>
    %34 = arith.mulf %33, %30 : vector<8x128xf32>
    %35 = arith.mulf %34, %30 : vector<8x128xf32>
    %36 = arith.mulf %35, %30 : vector<8x128xf32>
    %37 = arith.addf %30, %36 : vector<8x128xf32>
    %cst_16 = arith.constant 0.797884583 : f32
    %38 = vector.broadcast %cst_16 : f32 to vector<8x128xf32>
    %39 = arith.mulf %38, %37 : vector<8x128xf32>
    %40 = math.tanh %39 : vector<8x128xf32>
    %cst_17 = arith.constant 1.000000e+00 : f32
    %41 = vector.broadcast %cst_17 : f32 to vector<8x128xf32>
    %42 = arith.addf %41, %40 : vector<8x128xf32>
    %43 = arith.mulf %32, %42 : vector<8x128xf32>
    %44 = arith.truncf %43 : vector<8x128xf32> to vector<8x128xbf16>
    %c0_18 = arith.constant 0 : index
    %c0_19 = arith.constant 0 : index
    %45 = vector.load %arg6[%c0_18, %c0_19] : memref<128x32xbf16, #tpu.memory_space<vmem>>, vector<128x32xbf16>
    %cst_20 = arith.constant dense<0.000000e+00> : vector<8x32xf32>
    %46 = tpu.matmul %44, %45, %cst_20 {dimension_numbers = #tpu.dot_dimension_numbers<[1], [0], [0], [1], [0, 0, 1, 1], [], []>} : vector<8x128xbf16>, vector<128x32xbf16>, vector<8x32xf32> -> vector<8x32xf32>
    %c0_21 = arith.constant 0 : index
    %c0_22 = arith.constant 0 : index
    %47 = vector.load %arg7[%c0_21, %c0_22] : memref<1x32xf32, #tpu.memory_space<vmem>>, vector<1x32xf32>
    %48 = vector.broadcast %47 : vector<1x32xf32> to vector<8x32xf32>
    %49 = arith.addf %46, %48 : vector<8x32xf32>
    %50 = arith.addf %0, %49 : vector<8x32xf32>
    %c0_23 = arith.constant 0 : index
    %c0_24 = arith.constant 0 : index
    %51 = vector.load %arg8[%c0_23, %c0_24] : memref<8x32xf32, #tpu.memory_space<vmem>>, vector<8x32xf32>
    tpu.vector_store %arg8[%c0_23, %c0_24], %50 {strides = array<i32>} : memref<8x32xf32, #tpu.memory_space<vmem>>, vector<8x32xf32>,
    return
  }
  func.func @transform_0(%arg0: i32) -> (i32, i32) {
    %c0_i32 = arith.constant 0 : i32
    %c0_i32_0 = arith.constant 0 : i32
    return %arg0, %c0_i32 : i32, i32
  }
  func.func @transform_1(%arg0: i32) -> (i32, i32) {
    %c0_i32 = arith.constant 0 : i32
    %c0_i32_0 = arith.constant 0 : i32
    %c0_i32_1 = arith.constant 0 : i32
    return %c0_i32, %c0_i32_0 : i32, i32
  }
  func.func @transform_2(%arg0: i32) -> (i32, i32) {
    %c0_i32 = arith.constant 0 : i32
    %c0_i32_0 = arith.constant 0 : i32
    %c0_i32_1 = arith.constant 0 : i32
    return %c0_i32, %c0_i32_0 : i32, i32
  }
  func.func @transform_3(%arg0: i32) -> (i32, i32) {
    %c0_i32 = arith.constant 0 : i32
    %c0_i32_0 = arith.constant 0 : i32
    %c0_i32_1 = arith.constant 0 : i32
    return %c0_i32, %c0_i32_0 : i32, i32
  }
  func.func @transform_4(%arg0: i32) -> (i32, i32) {
    %c0_i32 = arith.constant 0 : i32
    %c0_i32_0 = arith.constant 0 : i32
    %c0_i32_1 = arith.constant 0 : i32
    return %c0_i32, %c0_i32_0 : i32, i32
  }
  func.func @transform_5(%arg0: i32) -> (i32, i32) {
    %c0_i32 = arith.constant 0 : i32
    %c0_i32_0 = arith.constant 0 : i32
    %c0_i32_1 = arith.constant 0 : i32
    return %c0_i32, %c0_i32_0 : i32, i32
  }
  func.func @transform_6(%arg0: i32) -> (i32, i32) {
    %c0_i32 = arith.constant 0 : i32
    %c0_i32_0 = arith.constant 0 : i32
    %c0_i32_1 = arith.constant 0 : i32
    return %c0_i32, %c0_i32_0 : i32, i32
  }
  func.func @transform_7(%arg0: i32) -> (i32, i32) {
    %c0_i32 = arith.constant 0 : i32
    %c0_i32_0 = arith.constant 0 : i32
    return %arg0, %c0_i32 : i32, i32
  }
}

module attributes {stable_mosaic.version = 11 : i64} {
  func.func @_lnf_score_kernel(%arg0: i32, %arg1: memref<8x32xf32, #tpu.memory_space<vmem>>, %arg2: memref<1x32xf32, #tpu.memory_space<vmem>>, %arg3: memref<1x32xf32, #tpu.memory_space<vmem>>, %arg4: memref<32x128xbf16, #tpu.memory_space<vmem>>, %arg5: memref<8x128xf32, #tpu.memory_space<vmem>>) attributes {dimension_semantics = [#tpu.dimension_semantics<parallel>], iteration_bounds = array<i64: 2>, scalar_prefetch = 0 : i64, scratch_operands = 0 : i64, tpu.core_type = #tpu.core_type<tc>, window_params = [{transform_indices = @transform_0, window_bounds = array<i64: 8, 32>}, {pipeline_mode = #tpu.pipeline_mode<synchronous>, transform_indices = @transform_1, window_bounds = array<i64: 1, 32>}, {pipeline_mode = #tpu.pipeline_mode<synchronous>, transform_indices = @transform_2, window_bounds = array<i64: 1, 32>}, {pipeline_mode = #tpu.pipeline_mode<synchronous>, transform_indices = @transform_3, window_bounds = array<i64: 32, 128>}, {transform_indices = @transform_4, window_bounds = array<i64: 8, 128>}]} {
    %c0 = arith.constant 0 : index
    %c0_0 = arith.constant 0 : index
    %0 = vector.load %arg1[%c0, %c0_0] : memref<8x32xf32, #tpu.memory_space<vmem>>, vector<8x32xf32>
    %c0_1 = arith.constant 0 : index
    %c0_2 = arith.constant 0 : index
    %1 = vector.load %arg2[%c0_1, %c0_2] : memref<1x32xf32, #tpu.memory_space<vmem>>, vector<1x32xf32>
    %c0_3 = arith.constant 0 : index
    %c0_4 = arith.constant 0 : index
    %2 = vector.load %arg3[%c0_3, %c0_4] : memref<1x32xf32, #tpu.memory_space<vmem>>, vector<1x32xf32>
    %cst = arith.constant dense<0.000000e+00> : vector<8xf32>
    %3 = vector.multi_reduction <add>, %0, %cst [1] : vector<8x32xf32> to vector<8xf32>
    %4 = vector.shape_cast %3 : vector<8xf32> to vector<8x1xf32>
    %cst_5 = arith.constant 3.200000e+01 : f32
    %5 = vector.broadcast %cst_5 : f32 to vector<8x1xf32>
    %6 = arith.divf %4, %5 : vector<8x1xf32>
    %7 = vector.broadcast %6 : vector<8x1xf32> to vector<8x32xf32>
    %8 = arith.subf %0, %7 : vector<8x32xf32>
    %9 = arith.mulf %8, %8 : vector<8x32xf32>
    %cst_6 = arith.constant dense<0.000000e+00> : vector<8xf32>
    %10 = vector.multi_reduction <add>, %9, %cst_6 [1] : vector<8x32xf32> to vector<8xf32>
    %11 = vector.shape_cast %10 : vector<8xf32> to vector<8x1xf32>
    %cst_7 = arith.constant 3.200000e+01 : f32
    %12 = vector.broadcast %cst_7 : f32 to vector<8x1xf32>
    %13 = arith.divf %11, %12 : vector<8x1xf32>
    %14 = vector.broadcast %6 : vector<8x1xf32> to vector<8x32xf32>
    %15 = arith.subf %0, %14 : vector<8x32xf32>
    %cst_8 = arith.constant 9.99999974E-6 : f32
    %16 = vector.broadcast %cst_8 : f32 to vector<8x1xf32>
    %17 = arith.addf %13, %16 : vector<8x1xf32>
    %18 = math.rsqrt %17 : vector<8x1xf32>
    %19 = vector.broadcast %18 : vector<8x1xf32> to vector<8x32xf32>
    %20 = arith.mulf %15, %19 : vector<8x32xf32>
    %21 = vector.broadcast %1 : vector<1x32xf32> to vector<8x32xf32>
    %22 = arith.mulf %20, %21 : vector<8x32xf32>
    %23 = vector.broadcast %2 : vector<1x32xf32> to vector<8x32xf32>
    %24 = arith.addf %22, %23 : vector<8x32xf32>
    %25 = arith.truncf %24 : vector<8x32xf32> to vector<8x32xbf16>
    %c0_9 = arith.constant 0 : index
    %c0_10 = arith.constant 0 : index
    %26 = vector.load %arg4[%c0_9, %c0_10] : memref<32x128xbf16, #tpu.memory_space<vmem>>, vector<32x128xbf16>
    %cst_11 = arith.constant dense<0.000000e+00> : vector<8x128xf32>
    %27 = tpu.matmul %25, %26, %cst_11 {dimension_numbers = #tpu.dot_dimension_numbers<[1], [0], [0], [1], [0, 0, 1, 1], [], []>} : vector<8x32xbf16>, vector<32x128xbf16>, vector<8x128xf32> -> vector<8x128xf32>
    %c0_12 = arith.constant 0 : index
    %c0_13 = arith.constant 0 : index
    %28 = vector.load %arg5[%c0_12, %c0_13] : memref<8x128xf32, #tpu.memory_space<vmem>>, vector<8x128xf32>
    tpu.vector_store %arg5[%c0_12, %c0_13], %27 {strides = array<i32>} : memref<8x128xf32, #tpu.memory_space<vmem>>, vector<8x128xf32>,
    return
  }
  func.func @transform_0(%arg0: i32) -> (i32, i32) {
    %c0_i32 = arith.constant 0 : i32
    %c0_i32_0 = arith.constant 0 : i32
    return %arg0, %c0_i32 : i32, i32
  }
  func.func @transform_1(%arg0: i32) -> (i32, i32) {
    %c0_i32 = arith.constant 0 : i32
    %c0_i32_0 = arith.constant 0 : i32
    %c0_i32_1 = arith.constant 0 : i32
    return %c0_i32, %c0_i32_0 : i32, i32
  }
  func.func @transform_2(%arg0: i32) -> (i32, i32) {
    %c0_i32 = arith.constant 0 : i32
    %c0_i32_0 = arith.constant 0 : i32
    %c0_i32_1 = arith.constant 0 : i32
    return %c0_i32, %c0_i32_0 : i32, i32
  }
  func.func @transform_3(%arg0: i32) -> (i32, i32) {
    %c0_i32 = arith.constant 0 : i32
    %c0_i32_0 = arith.constant 0 : i32
    %c0_i32_1 = arith.constant 0 : i32
    return %c0_i32, %c0_i32_0 : i32, i32
  }
  func.func @transform_4(%arg0: i32) -> (i32, i32) {
    %c0_i32 = arith.constant 0 : i32
    %c0_i32_0 = arith.constant 0 : i32
    return %arg0, %c0_i32 : i32, i32
  }
}

</mosaic_0001>

<bundles_post_ra>
// kernel: gpt2_classifier_forward.10
= control target key start
LH: loop header
LB: loop body
LE: loop exit
PB: predicated region body
PF: predicated region fallthrough
CT: control target
= control target key end

     0   :  { %s570_s9 = smov 0   ;;  %s637_s0 = inlined_call_operand.vmem [shape: f32[2,8,96], index: 0, kind: input, shape index: {}]   ;;  %s638_s1 = inlined_call_operand.vmem [shape: f32[2,8,8], index: 1, kind: input, shape index: {}]   ;;  %s639_s2 = inlined_call_operand.vmem [shape: f32[2,8,32], index: 2, kind: output, shape index: {}]  }
   0x1 LB: > { %s477_s10 = sadd.s32 4294967295, %s539_s9   ;;  %p481_p0 = scmp.ge.s32.totalorder %s539_s9, 1  ;;  %s539_s9 = sphi %s570_s9, %s12_s9  }
   0x2   : > { %p120_p1 = scmp.lt.s32.totalorder %s539_s9, 3 }
   0x4   : > { %p121_p2 = pnand %p481_p0, %p120_p1 }
   0x5   : > { %p144_p3 = scmp.lt.s32.totalorder (!%p121_p2), %s477_s10, 1  ;;  %s541_s15 = smov (!%p121_p2), 96  }
   0x6   : > { %124 = sbr.rel (%p121_p2) target bundleno = 1197 (0x4ad), region = 28  ;;  %s542_s16 = smov (!%p121_p2), 88  }
   0x7   : > { %s543_s17 = smov (!%p121_p2), 120   ;;  %s544_s18 = smov (!%p121_p2), 64  }
   0x8   : > { %s545_s19 = smov (!%p121_p2), 80   ;;  %s546_s20 = smov (!%p121_p2), 72  }
   0x9   : > { %s547_s21 = smov (!%p121_p2), 112   ;;  %s548_s22 = smov (!%p121_p2), 104  }
   0xa   : > { %s549_s26 = smov (!%p121_p2), 56   ;;  %s550_s27 = smov (!%p121_p2), 40  }
   0xb   : > { %s641_s10 = smov (!%p144_p3, %s477_s10), 1  ;;  %vm163_vm0 = vcmask 64512   ;;  %vm202_vm1 = vcmask 1043456   ;;  %s551_s28 = smov 48   ;;  %vm406_vm2 = vcmask 130048   ;;  %vm408_vm3 = vcmask 195584  }
   0xc   : > { %s578_s11 = sshll.u32 %s641_s10, 3  ;;  %s552_s29 = smov 8   ;;  %vm410_vm4 = vcmask 261120  }
   0xd   : > { %s147_s14 = scalar_lea.vmem %s637_s0, %s578_s11  ;;  %s151_s25 = scalar_lea.vmem %s638_s1, %s578_s11 }
   0xe   : > { %v157_v0 = vld [vmem:[%s147_s14] sm:$0xff]  ;;  %s553_s30 = smov 16   ;;  %s554_s3 = smov 24  }
   0xf   : > { %v584_v1 = vpack.c.bf16 %v157_v0, %v157_v0  ;;  %v158_v8 = vld [vmem:[%s151_s25] sm:$0xff]  ;;  %s155_s6 = scalar_lea.vmem %s639_s2, %s578_s11 }
  0x11   : > { %161 = vrot.lane.b32.xlu0 %v584_v1, %s541_s15  ;;  %221 = vrot.lane.b32.xlu1 %v584_v1, %s542_s16 }
  0x12   : > { %219 = vrot.lane.b32.xlu2 %v584_v1, %s543_s17 }
  0x1a   : > { %197 = vrot.lane.b32.xlu2 %v584_v1, %s544_s18 }
  0x22   : > { %279 = vrot.lane.b32.xlu2 %v584_v1, %s545_s19 }
  0x2a   : > { %337 = vrot.lane.b32.xlu2 %v584_v1, %s546_s20 }
  0x32   : > { %277 = vrot.lane.b32.xlu2 %v584_v1, %s547_s21 }
  0x3a   : > { %335 = vrot.lane.b32.xlu2 %v584_v1, %s548_s22 }
  0x6c   : > { %v220_v6 = vpop.permute.xlu2 %219 }
  0x74   : > { %v198_v13 = vpop.permute.xlu2 %197 }
  0x75   : > { %v204_v18 = vsel %vm202_vm1, %v198_v13, 0 }
  0x76   : > { %213 = vmatpush.bf16.msra.mxu1 %v204_v18 }
  0x7c   : > { %v280_v14 = vpop.permute.xlu2 %279 }
  0x7d   : > { %v285_v16 = vsel %vm163_vm0, %v280_v14, 0 }
  0x7e   : > { %294 = vmatpush.bf16.xpose.msrb.mxu1 %v285_v16 }
  0x83   : > { %v162_v2 = vpop.permute.xlu0 %161  ;;  %v222_v4 = vpop.permute.xlu1 %221 }
  0x84   : > { %v168_v3 = vsel %vm163_vm0, %v162_v2, 0  ;;  %v227_v5 = vsel %vm163_vm0, %v222_v4, 0  ;;  %v338_v15 = vpop.permute.xlu2 %337 }
  0x85   : > { %177 = vmatpush.bf16.xpose.msra.mxu0 %v168_v3  ;;  %236 = vmatpush.bf16.xpose.msra.mxu2 %v227_v5  ;;  %v343_v17 = vsel %vm163_vm0, %v338_v15, 0 }
  0x8c   : > { %485 = vmatmul.msk.bf16.vlgmr.msra.gmra.mxu0 %vm163_vm0, %v584_v1  ;;  %487 = vmatmul.msk.bf16.vlgmr.msra.gmra.mxu2 %vm163_vm0, %v220_v6  ;;  %v278_v19 = vpop.permute.xlu2 %277 }
  0x8d   : > { %352 = vmatpush.bf16.xpose.msrb.mxu0 %v343_v17 }
  0x94   : > { %v336_v22 = vpop.permute.xlu2 %335 }
  0x9c   : > { %491 = vmatmul.msk.bf16.vlgmr.msrb.gmra.mxu0 %vm163_vm0, %v336_v22 }
 0x109   : > { %v179_v7 = vpop.f32.mrf.mxu0 }
 0x10a   : > { %v183_v9 = vmul.f32 0.35355338, %v179_v7 }
 0x10c   : > { %v184_v10 = vadd.f32 %v183_v9, %v158_v8 }
 0x10e   : > { %v185_v11 = vsel %vm163_vm0, %v184_v10, -inf }
 0x10f   : > { %186 = vmax.xlane.f32.xlu0 %v185_v11  ;;  %v238_v20 = vpop.f32.mrf.mxu2 }
 0x110   : > { %v242_v21 = vmul.f32 0.35355338, %v238_v20 }
 0x111   : > { %v181_v12 = vpop.f32.mrf.mxu0 }
 0x112   : > { %v243_v23 = vadd.f32 %v242_v21, %v158_v8 }
 0x114   : > { %v244_v25 = vsel %vm163_vm0, %v243_v23, -inf }
 0x115   : > { %245 = vmax.xlane.f32.xlu2 %v244_v25 }
 0x117   : > { %v240_v28 = vpop.f32.mrf.mxu2 }
 0x119   : > { %v354_v31 = vpop.f32.mrf.mxu0 }
 0x11a   : > { %v358_v32 = vmul.f32 0.35355338, %v354_v31 }
 0x11c   : > { %v359_v33 = vadd.f32 %v358_v32, %v158_v8 }
 0x11e   : > { %v360_v35 = vsel %vm163_vm0, %v359_v33, -inf }
 0x121   : > { %v356_v36 = vpop.f32.mrf.mxu0 }
 0x182   : > { %v187_v24 = vpop.xlane.xlu0 %186 }
 0x183   : > { %v188_v26 = vsub.f32 %v184_v10, %v187_v24 }
 0x185   : > { %v189_v27 = vmul.f32 1.442695, %v188_v26 }
 0x187   : > { %517 = vpow2.f32 %v189_v27 }
 0x188   : > { %v246_v42 = vpop.xlane.xlu2 %245 }
 0x189   : > { %v247_v43 = vsub.f32 %v243_v23, %v246_v42 }
 0x18b   : > { %v248_v44 = vmul.f32 1.442695, %v247_v43 }
 0x18d   : > { %v518_v29 = vpop.eup %517 }
 0x18e   : > { %v191_v30 = vsel %vm163_vm0, %v518_v29, 0.0 }
 0x18f   : > { %192 = vadd.xlane.f32.xlu1 %v191_v30 }
 0x197   : > { %361 = vmax.xlane.f32.xlu1 %v360_v35 }
 0x1b0   : > { %256 = vrot.lane.b32.xlu1 %v584_v1, %s549_s26 }
 0x1b8   : > { %372 = vrot.lane.b32.xlu1 %v584_v1, %s550_s27 }
 0x202   : > { %v193_v34 = vpop.xlane.xlu1 %192 }
 0x203   : > { %519 = vrcp.f32 %v193_v34 }
 0x204   : > { %521 = vpow2.f32 %v248_v44 }
 0x209   : > { %v520_v37 = vpop.eup %519 }
 0x20a   : > { %v195_v38 = vmul.f32 %v520_v37, %v518_v29  ;;  %v362_v46 = vpop.xlane.xlu1 %361  ;;  %v522_v53 = vpop.eup %521 }
 0x20b   : > { %v363_v49 = vsub.f32 %v359_v33, %v362_v46  ;;  %v250_v54 = vsel %vm163_vm0, %v522_v53, 0.0 }
 0x20c   : > { %v196_v39 = vpack.c.bf16 %v195_v38, %v195_v38 }
 0x20d   : > { %v364_v51 = vmul.f32 1.442695, %v363_v49 }
 0x20e   : > { %486 = vmatmul.msk.bf16.vlgmr.msra.gmra.mxu1 %vm163_vm0, %v196_v39 }
 0x20f   : > { %523 = vpow2.f32 %v364_v51 }
 0x215   : > { %v524_v55 = vpop.eup %523 }
 0x216   : > { %v366_v56 = vsel %vm163_vm0, %v524_v55, 0.0 }
 0x21e   : > { %489 = vmatmul.msk.bf16.vlgmr.msrb.gmra.mxu1 %vm163_vm0, %v278_v19 }
 0x222   : > { %v257_v57 = vpop.permute.xlu1 %256 }
 0x223   : > { %v262_v58 = vsel %vm202_vm1, %v257_v57, 0 }
 0x224   : > { %271 = vmatpush.bf16.msra.mxu3 %v262_v58 }
 0x22a   : > { %v373_v59 = vpop.permute.xlu1 %372 }
 0x22b   : > { %v378_v60 = vsel %vm202_vm1, %v373_v59, 0 }
 0x22c   : > { %387 = vmatpush.bf16.msrb.mxu2 %v378_v60 }
 0x28b   : > { %v615_v40 = vpop.f32.mrf.mxu1 }
 0x293   : > { %v217_v41 = vpop.f32.mrf.mxu1 }
 0x29b   : > { %v296_v45 = vpop.f32.mrf.mxu1 }
 0x29c   : > { %v300_v47 = vmul.f32 0.35355338, %v296_v45 }
 0x29e   : > { %v301_v48 = vadd.f32 %v300_v47, %v158_v8 }
 0x2a0   : > { %v302_v50 = vsel %vm163_vm0, %v301_v48, -inf }
 0x2a1   : > { %303 = vmax.xlane.f32.xlu0 %v302_v50 }
 0x2a3   : > { %v298_v52 = vpop.f32.mrf.mxu1 }
 0x2a9   : > { %251 = vadd.xlane.f32.xlu0 %v250_v54 }
 0x2b1   : > { %367 = vadd.xlane.f32.xlu0 %v366_v56 }
 0x314   : > { %v304_v61 = vpop.xlane.xlu0 %303 }
 0x315   : > { %v305_v62 = vsub.f32 %v301_v48, %v304_v61 }
 0x317   : > { %v306_v63 = vmul.f32 1.442695, %v305_v62 }
 0x319   : > { %525 = vpow2.f32 %v306_v63 }
 0x31c   : > { %v252_v0 = vpop.xlane.xlu0 %251 }
 0x31d   : > { %527 = vrcp.f32 %v252_v0 }
 0x31f   : > { %v526_v2 = vpop.eup %525 }
 0x320   : > { %v308_v3 = vsel %vm163_vm0, %v526_v2, 0.0 }
 0x321   : > { %309 = vadd.xlane.f32.xlu0 %v308_v3 }
 0x323   : > { %v528_v4 = vpop.eup %527 }
 0x324   : > { %v368_v5 = vpop.xlane.xlu0 %367  ;;  %v254_v6 = vmul.f32 %v528_v4, %v522_v53 }
 0x325   : > { %529 = vrcp.f32 %v368_v5 }
 0x326   : > { %v255_v7 = vpack.c.bf16 %v254_v6, %v254_v6 }
 0x328   : > { %488 = vmatmul.msk.bf16.vlgmr.msra.gmra.mxu3 %vm163_vm0, %v255_v7 }
 0x32b   : > { %v530_v8 = vpop.eup %529 }
 0x32c   : > { %v370_v9 = vmul.f32 %v530_v8, %v524_v55 }
 0x32e   : > { %v371_v10 = vpack.c.bf16 %v370_v9, %v370_v9 }
 0x330   : > { %492 = vmatmul.msk.bf16.vlgmr.msrb.gmra.mxu2 %vm163_vm0, %v371_v10 }
 0x335   : > { %314 = vrot.lane.b32.xlu0 %v584_v1, %s551_s28 }
 0x394   : > { %v310_v11 = vpop.xlane.xlu0 %309 }
 0x395   : > { %531 = vrcp.f32 %v310_v11 }
 0x39b   : > { %v532_v12 = vpop.eup %531 }
 0x39c   : > { %v312_v13 = vmul.f32 %v532_v12, %v526_v2 }
 0x39e   : > { %v313_v16 = vpack.c.bf16 %v312_v13, %v312_v13 }
 0x3a7   : > { %v315_v14 = vpop.permute.xlu0 %314 }
 0x3a8   : > { %v320_v15 = vsel %vm202_vm1, %v315_v14, 0 }
 0x3a9   : > { %329 = vmatpush.bf16.msrb.mxu3 %v320_v15 }
 0x3ab   : > { %v273_v17 = vpop.f32.mrf.mxu3 }
 0x3ac   : > { %490 = vmatmul.msk.bf16.vlgmr.msrb.gmra.mxu3 %vm163_vm0, %v313_v16  ;;  %394 = vrot.lane.b32.xlu2 %v273_v17, %s552_s29 }
 0x3b3   : > { %v275_v18 = vpop.f32.mrf.mxu3  ;;  %v389_v19 = vpop.f32.mrf.mxu2 }
 0x3bb   : > { %v391_v20 = vpop.f32.mrf.mxu2 }
 0x406   : > { %v395_v23 = vpop.permute.xlu2 %394 }
 0x407   : > { %v405_v24 = vsel %vm163_vm0, %v615_v40, %v395_v23 }
 0x42f   : > { %v331_v21 = vpop.f32.mrf.mxu3 }
 0x430   : > { %398 = vrot.lane.b32.xlu1 %v331_v21, %s553_s30 }
 0x437   : > { %v333_v1 = vpop.f32.mrf.mxu3 }
 0x438   : > { %402 = vrot.lane.b32.xlu1 %v389_v19, %s554_s3 }
 0x4a2   : > { %v399_v22 = vpop.permute.xlu1 %398 }
 0x4a3   : > { %v407_v25 = vsel %vm406_vm2, %v405_v24, %v399_v22 }
 0x4aa   : > { %v403_v26 = vpop.permute.xlu1 %402 }
 0x4ab   : > { %v409_v27 = vsel %vm408_vm3, %v407_v25, %v403_v26 }
 0x4ac   : > { %411 = vst.msk [vmem:[%s155_s6] sm:$0xff] %vm410_vm4, %v409_v27 }
 0x4ad PF: > { %s12_s9 = sadd.s32 1, %s539_s9  }
 0x4ae   : > { %p9_p4 = scmp.ge.s32.totalorder %s12_s9, 4  }
 0x4b0   :  { %11 = sbr.rel (!%p9_p4) target bundleno = 1 (0x1), region = 61 }

// kernel: gpt2_classifier_forward.11
= control target key start
LH: loop header
LB: loop body
LE: loop exit
PB: predicated region body
PF: predicated region fallthrough
CT: control target
= control target key end

     0   :  { %s381_s15 = smov 0   ;;  %s410_s0 = inlined_call_operand.vmem [shape: f32[16,32], index: 0, kind: input, shape index: {}]   ;;  %s411_s1 = inlined_call_operand.vmem [shape: bf16[32,32], index: 1, kind: input, shape index: {}]   ;;  %s412_s2 = inlined_call_operand.vmem [shape: f32[1,32], index: 2, kind: input, shape index: {}]   ;;  %s413_s3 = inlined_call_operand.vmem [shape: f32[16,32], index: 3, kind: input, shape index: {}]   ;;  %s414_s4 = inlined_call_operand.vmem [shape: f32[16,32], index: 4, kind: output, shape index: {}]  }
   0x1 LB: > { %s318_s16 = sadd.s32 4294967295, %s354_s15   ;;  %p322_p0 = scmp.ge.s32.totalorder %s354_s15, 1  ;;  %s354_s15 = sphi %s381_s15, %s14_s15  }
   0x2   : > { %p170_p1 = scmp.lt.s32.totalorder %s354_s15, 3 }
   0x4   : > { %p171_p2 = pnand %p322_p0, %p170_p1 }
   0x5   : > { %p198_p3 = scmp.lt.s32.totalorder (!%p171_p2), %s318_s16, 1 }
   0x6   : > { %174 = sbr.rel (%p171_p2) target bundleno = 153 (0x99), region = 36 }
   0xb   : > { %v338_v0 = vld [vmem:[%s411_s1 + $0x8] sm:$0xff]  ;;  %v337_v1 = vld [vmem:[%s411_s1] sm:$0xff]  ;;  %s416_s16 = smov (!%p198_p3, %s318_s16), 1  ;;  %vm233_vm0 = vcmask 261120  }
   0xc   : > { %243 = vmatpush.bf16.msra.mxu0 %v338_v0  ;;  %s323_s21 = sshll.u32 %s416_s16, 3  ;;  %v347_v4 = vld [vmem:[%s412_s2] ss:$0 sm:$0xff] }
   0xd   : > { %s201_s24 = scalar_lea.vmem %s410_s0, %s323_s21  ;;  %s205_s27 = scalar_lea.vmem %s413_s3, %s323_s21 }
   0xe   : > { %v211_v2 = vld [vmem:[%s201_s24] sm:$0xff]  ;;  %s209_s6 = scalar_lea.vmem %s414_s4, %s323_s21 }
   0xf   : > { %v212_v3 = vpack.c.bf16 %v211_v2, %v211_v2  ;;  %v250_v6 = vld [vmem:[%s205_s27] sm:$0xff] }
  0x10   : > { %244 = vmatpush.bf16.msra.mxu0 %v337_v1 }
  0x13   : > { %334 = vmatmul.msk.bf16.vlgmr.msra.gmra.mxu0 %vm233_vm0, %v212_v3 }
  0x90   : > { %v246_v5 = vpop.f32.mrf.mxu0 }
  0x91   : > { %v247_v7 = vadd.f32 %v347_v4, %v246_v5 }
  0x93   : > { %v251_v8 = vadd.f32 %v250_v6, %v247_v7 }
  0x95   : > { %252 = vst.msk [vmem:[%s209_s6] sm:$0xff] %vm233_vm0, %v251_v8 }
  0x98   : > { %v248_v9 = vpop.f32.mrf.mxu0 }
  0x99 PF: > { %s14_s15 = sadd.s32 1, %s354_s15  }
  0x9a   : > { %p11_p4 = scmp.ge.s32.totalorder %s14_s15, 4  }
  0x9c   :  { %13 = sbr.rel (!%p11_p4) target bundleno = 1 (0x1), region = 69 }

// kernel: gpt2_classifier_forward.9
= control target key start
LH: loop header
LB: loop body
LE: loop exit
PB: predicated region body
PF: predicated region fallthrough
CT: control target
= control target key end

     0   :  { %s429_s18 = smov 0   ;;  %s471_s0 = inlined_call_operand.vmem [shape: f32[16,32], index: 0, kind: input, shape index: {}]   ;;  %s472_s1 = inlined_call_operand.vmem [shape: f32[1,32], index: 1, kind: input, shape index: {}]   ;;  %s473_s2 = inlined_call_operand.vmem [shape: f32[1,32], index: 2, kind: input, shape index: {}]   ;;  %s474_s3 = inlined_call_operand.vmem [shape: bf16[32,96], index: 3, kind: input, shape index: {}]   ;;  %s475_s4 = inlined_call_operand.vmem [shape: f32[1,96], index: 4, kind: input, shape index: {}]   ;;  %s476_s5 = inlined_call_operand.vmem [shape: f32[16,96], index: 5, kind: output, shape index: {}]  }
   0x1 LB: > { %s354_s19 = sadd.s32 4294967295, %s396_s18   ;;  %p358_p0 = scmp.ge.s32.totalorder %s396_s18, 1  ;;  %s396_s18 = sphi %s429_s18, %s15_s18  }
   0x2   : > { %p186_p1 = scmp.lt.s32.totalorder %s396_s18, 3 }
   0x4   : > { %p187_p2 = pnand %p358_p0, %p186_p1 }
   0x5   : > { %p212_p3 = scmp.lt.s32.totalorder (!%p187_p2), %s354_s19, 1 }
   0x6   : > { %190 = sbr.rel (%p187_p2) target bundleno = 419 (0x1a3), region = 40 }
   0xb   : > { %s478_s19 = smov (!%p212_p3, %s354_s19), 1  ;;  %vm224_vm0 = vcmask 261120   ;;  %v398_v2 = vmov 32.0   ;;  %v373_v14 = vld [vmem:[%s474_s3 + $0x8] sm:$0xff]  ;;  %v372_v15 = vld [vmem:[%s474_s3] sm:$0xff]  ;;  %vm299_vm5 = vcmask 785408  }
   0xc   : > { %s359_s20 = sshll.u32 %s478_s19, 3  ;;  %386 = vrcp.f32 %v398_v2  ;;  %292 = vmatpush.bf16.msra.mxu0 %v373_v14  ;;  %v383_v25 = vld [vmem:[%s472_s1] ss:$0 sm:$0xff] }
   0xd   : > { %s215_s23 = scalar_lea.vmem %s471_s0, %s359_s20  ;;  %v384_v28 = vld [vmem:[%s473_s2] ss:$0 sm:$0xff]  ;;  %s219_s11 = scalar_lea.vmem %s476_s5, %s359_s20 }
   0xe   : > { %v221_v0 = vld [vmem:[%s215_s23] sm:$0xff] }
   0xf   : > { %v225_v1 = vsel %vm224_vm0, %v221_v0, 0.0  ;;  %v385_v32 = vld [vmem:[%s475_s4] ss:$0 sm:$0xff] }
  0x10   : > { %226 = vadd.xlane.f32.xlu0 %v225_v1  ;;  %293 = vmatpush.bf16.msra.mxu0 %v372_v15 }
  0x12   : > { %v387_v3 = vpop.eup %386 }
  0x13   : > { %v229_v4 = vmul.f32 32.0, %v387_v3  ;;  %vm233_vm1 = vweird.f32 %v387_v3 }
  0x15   : > { %v230_v5 = vsub.f32 1.0, %v229_v4 }
  0x17   : > { %v231_v6 = vmul.f32 %v387_v3, %v230_v5 }
  0x19   : > { %v232_v7 = vadd.f32 %v387_v3, %v231_v6 }
  0x1b   : > { %v234_v8 = vsel %vm233_vm1, %v387_v3, %v232_v7 }
  0x83   : > { %v227_v9 = vpop.xlane.xlu0 %226 }
  0x84   : > { %v235_v10 = vmul.f32 %v234_v8, %v227_v9 }
  0x86   : > { %v236_v11 = vsub.f32 %v221_v0, %v235_v10 }
  0x88   : > { %v237_v12 = vmul.f32 %v236_v11, %v236_v11 }
  0x8a   : > { %v238_v13 = vsel %vm224_vm0, %v237_v12, 0.0 }
  0x8b   : > { %239 = vadd.xlane.f32.xlu0 %v238_v13 }
  0xfe   : > { %v240_v16 = vpop.xlane.xlu0 %239 }
  0xff   : > { %v241_v17 = vmul.f32 %v240_v16, %v234_v8 }
 0x101   : > { %v242_v18 = vadd.f32 1e-05, %v241_v17 }
 0x103   : > { %388 = vrsqrt.f32 %v242_v18  ;;  %vm249_vm3 = vweird.f32 %v242_v18 }
 0x109   : > { %v389_v19 = vpop.eup %388 }
 0x10a   : > { %v244_v20 = vmul.f32 %v389_v19, %v242_v18  ;;  %vm250_vm2 = vweird.f32 %v389_v19 }
 0x10b   : > { %vm251_vm4 = vmor %vm249_vm3, %vm250_vm2 }
 0x10c   : > { %v245_v21 = vmul.f32 %v389_v19, %v244_v20 }
 0x10e   : > { %v246_v22 = vmul.f32 0.5, %v245_v21 }
 0x110   : > { %v247_v23 = vsub.f32 1.5, %v246_v22 }
 0x112   : > { %v248_v24 = vmul.f32 %v389_v19, %v247_v23 }
 0x114   : > { %v252_v26 = vsel %vm251_vm4, %v389_v19, %v248_v24 }
 0x115   : > { %v253_v27 = vmul.f32 %v252_v26, %v236_v11 }
 0x117   : > { %v257_v29 = vmul.f32 %v383_v25, %v253_v27 }
 0x119   : > { %v261_v30 = vadd.f32 %v384_v28, %v257_v29 }
 0x11b   : > { %v262_v31 = vpack.c.bf16 %v261_v30, %v261_v30 }
 0x11d   : > { %369 = vmatmul.msk.bf16.vlgmr.msra.gmra.mxu0 %vm224_vm0, %v262_v31 }
 0x19a   : > { %v295_v33 = vpop.f32.mrf.mxu0 }
 0x19b   : > { %v296_v34 = vadd.f32 %v385_v32, %v295_v33 }
 0x19d   : > { %300 = vst.msk [vmem:[%s219_s11] sm:$0xff] %vm299_vm5, %v296_v34 }
 0x1a2   : > { %v297_v35 = vpop.f32.mrf.mxu0 }
 0x1a3 PF: > { %s15_s18 = sadd.s32 1, %s396_s18  }
 0x1a4   : > { %p12_p4 = scmp.ge.s32.totalorder %s15_s18, 4  }
 0x1a6   :  { %14 = sbr.rel (!%p12_p4) target bundleno = 1 (0x1), region = 70 }

// kernel: gpt2_classifier_forward.12
= control target key start
LH: loop header
LB: loop body
LE: loop exit
PB: predicated region body
PF: predicated region fallthrough
CT: control target
= control target key end

     0   :  { %s627_s24 = smov 0   ;;  %s702_s0 = inlined_call_operand.vmem [shape: f32[16,32], index: 0, kind: input, shape index: {}]   ;;  %s703_s1 = inlined_call_operand.vmem [shape: f32[1,32], index: 1, kind: input, shape index: {}]   ;;  %s704_s2 = inlined_call_operand.vmem [shape: f32[1,32], index: 2, kind: input, shape index: {}]   ;;  %s705_s3 = inlined_call_operand.vmem [shape: bf16[32,128], index: 3, kind: input, shape index: {}]   ;;  %s706_s4 = inlined_call_operand.vmem [shape: f32[1,128], index: 4, kind: input, shape index: {}]   ;;  %s707_s5 = inlined_call_operand.vmem [shape: bf16[128,32], index: 5, kind: input, shape index: {}]   ;;  %s708_s6 = inlined_call_operand.vmem [shape: f32[1,32], index: 6, kind: input, shape index: {}]   ;;  %s709_s7 = inlined_call_operand.vmem [shape: f32[16,32], index: 7, kind: output, shape index: {}]  }
   0x1 LB: > { %s499_s25 = sadd.s32 4294967295, %s584_s24   ;;  %p503_p0 = scmp.ge.s32.totalorder %s584_s24, 1  ;;  %s584_s24 = sphi %s627_s24, %s17_s24  }
   0x2   : > { %p236_p1 = scmp.lt.s32.totalorder %s584_s24, 3 }
   0x4   : > { %p237_p2 = pnand %p503_p0, %p236_p1 }
   0x5   : > { %p266_p3 = scmp.lt.s32.totalorder (!%p237_p2), %s499_s25, 1 }
   0x6   : > { %240 = sbr.rel (%p237_p2) target bundleno = 570 (0x23a), region = 48 }
   0xb   : > { %s711_s25 = smov (!%p266_p3, %s499_s25), 1  ;;  %vm278_vm0 = vcmask 261120   ;;  %v586_v2 = vmov 32.0   ;;  %v550_v14 = vld [vmem:[%s705_s3 + $0x8] sm:$0xff]  ;;  %v549_v15 = vld [vmem:[%s705_s3] sm:$0xff]  ;;  %v558_v16 = vld [vmem:[%s707_s5 + $0x38] sm:$0xff] }
   0xc   : > { %s504_s26 = sshll.u32 %s711_s25, 3  ;;  %572 = vrcp.f32 %v586_v2  ;;  %346 = vmatpush.bf16.msra.mxu0 %v550_v14  ;;  %431 = vmatpush.bf16.msra.mxu1 %v558_v16  ;;  %v557_v19 = vld [vmem:[%s707_s5 + $0x30] sm:$0xff]  ;;  %v568_v27 = vld [vmem:[%s703_s1] ss:$0 sm:$0xff]  ;;  %v556_v34 = vld [vmem:[%s707_s5 + $0x28] sm:$0xff] }
   0xd   : > { %s269_s29 = scalar_lea.vmem %s702_s0, %s504_s26  ;;  %v569_v30 = vld [vmem:[%s704_s2] ss:$0 sm:$0xff]  ;;  %v554_v36 = vld [vmem:[%s707_s5 + $0x18] sm:$0xff]  ;;  %v553_v37 = vld [vmem:[%s707_s5 + $0x10] sm:$0xff]  ;;  %s273_s17 = scalar_lea.vmem %s709_s7, %s504_s26 }
   0xe   : > { %v643_v0 = vld [vmem:[%s269_s29] sm:$0xff]  ;;  %v552_v38 = vld [vmem:[%s707_s5 + $0x8] sm:$0xff] }
   0xf   : > { %v279_v1 = vsel %vm278_vm0, %v643_v0, 0.0  ;;  %v555_v35 = vld [vmem:[%s707_s5 + $0x20] sm:$0xff] }
  0x10   : > { %280 = vadd.xlane.f32.xlu0 %v279_v1  ;;  %347 = vmatpush.bf16.msra.mxu0 %v549_v15  ;;  %v551_v39 = vld [vmem:[%s707_s5] sm:$0xff] }
  0x11   : > { %432 = vmatpush.bf16.msra.mxu1 %v557_v19  ;;  %v570_v40 = vld [vmem:[%s706_s4] ss:$0 sm:$0xff] }
  0x12   : > { %v573_v3 = vpop.eup %572  ;;  %v571_v54 = vld [vmem:[%s708_s6] ss:$0 sm:$0xff] }
  0x13   : > { %v283_v4 = vmul.f32 32.0, %v573_v3  ;;  %vm287_vm1 = vweird.f32 %v573_v3 }
  0x15   : > { %v284_v5 = vsub.f32 1.0, %v283_v4  ;;  %433 = vmatpush.bf16.msra.mxu1 %v556_v34 }
  0x17   : > { %v285_v6 = vmul.f32 %v573_v3, %v284_v5 }
  0x19   : > { %v286_v7 = vadd.f32 %v573_v3, %v285_v6  ;;  %434 = vmatpush.bf16.msra.mxu1 %v555_v35 }
  0x1b   : > { %v288_v8 = vsel %vm287_vm1, %v573_v3, %v286_v7 }
  0x1d   : > { %435 = vmatpush.bf16.msra.mxu1 %v554_v36 }
  0x21   : > { %436 = vmatpush.bf16.msra.mxu1 %v553_v37 }
  0x25   : > { %437 = vmatpush.bf16.msra.mxu1 %v552_v38 }
  0x29   : > { %438 = vmatpush.bf16.msra.mxu1 %v551_v39 }
  0x83   : > { %v281_v9 = vpop.xlane.xlu0 %280 }
  0x84   : > { %v289_v10 = vmul.f32 %v288_v8, %v281_v9 }
  0x86   : > { %v290_v11 = vsub.f32 %v643_v0, %v289_v10 }
  0x88   : > { %v291_v12 = vmul.f32 %v290_v11, %v290_v11 }
  0x8a   : > { %v292_v13 = vsel %vm278_vm0, %v291_v12, 0.0 }
  0x8b   : > { %293 = vadd.xlane.f32.xlu0 %v292_v13 }
  0xfe   : > { %v294_v17 = vpop.xlane.xlu0 %293 }
  0xff   : > { %v295_v18 = vmul.f32 %v294_v17, %v288_v8 }
 0x101   : > { %v296_v20 = vadd.f32 1e-05, %v295_v18 }
 0x103   : > { %574 = vrsqrt.f32 %v296_v20  ;;  %vm303_vm3 = vweird.f32 %v296_v20 }
 0x109   : > { %v575_v21 = vpop.eup %574 }
 0x10a   : > { %v298_v22 = vmul.f32 %v575_v21, %v296_v20  ;;  %vm304_vm2 = vweird.f32 %v575_v21 }
 0x10b   : > { %vm305_vm4 = vmor %vm303_vm3, %vm304_vm2 }
 0x10c   : > { %v299_v23 = vmul.f32 %v575_v21, %v298_v22 }
 0x10e   : > { %v300_v24 = vmul.f32 0.5, %v299_v23 }
 0x110   : > { %v301_v25 = vsub.f32 1.5, %v300_v24 }
 0x112   : > { %v302_v26 = vmul.f32 %v575_v21, %v301_v25 }
 0x114   : > { %v306_v28 = vsel %vm305_vm4, %v575_v21, %v302_v26 }
 0x115   : > { %v307_v29 = vmul.f32 %v306_v28, %v290_v11 }
 0x117   : > { %v311_v31 = vmul.f32 %v568_v27, %v307_v29 }
 0x119   : > { %v315_v32 = vadd.f32 %v569_v30, %v311_v31 }
 0x11b   : > { %v316_v33 = vpack.c.bf16 %v315_v32, %v315_v32 }
 0x11d   : > { %514 = vmatmul.msk.bf16.vlgmr.msra.gmra.mxu0 %vm278_vm0, %v316_v33 }
 0x19a   : > { %v349_v41 = vpop.f32.mrf.mxu0 }
 0x19b   : > { %v350_v42 = vadd.f32 %v570_v40, %v349_v41 }
 0x19d   : > { %v354_v43 = vmul.f32 0.044715, %v350_v42  ;;  %v353_v50 = vmul.f32 0.5, %v350_v42 }
 0x19f   : > { %v355_v44 = vmul.f32 %v354_v43, %v350_v42 }
 0x1a1   : > { %v356_v45 = vmul.f32 %v355_v44, %v350_v42 }
 0x1a2   : > { %v351_v46 = vpop.f32.mrf.mxu0 }
 0x1a3   : > { %v357_v47 = vadd.f32 %v356_v45, %v350_v42 }
 0x1a5   : > { %v358_v48 = vmul.f32 0.7978846, %v357_v47 }
 0x1a7   : > { %576 = vtanh.f32 %v358_v48 }
 0x1ad   : > { %v577_v49 = vpop.eup %576 }
 0x1ae   : > { %v360_v51 = vadd.f32 1.0, %v577_v49 }
 0x1b0   : > { %v361_v52 = vmul.f32 %v360_v51, %v353_v50 }
 0x1b2   : > { %v362_v53 = vpack.c.bf16 %v361_v52, %v361_v52 }
 0x1b4   : > { %439 = vmatmul.bf16.vlgmr.msra.gmra.mxu1 %v362_v53 }
 0x231   : > { %v440_v55 = vpop.f32.mrf.mxu1 }
 0x232   : > { %v441_v56 = vadd.f32 %v571_v54, %v440_v55 }
 0x234   : > { %v444_v57 = vadd.f32 %v441_v56, %v643_v0 }
 0x236   : > { %445 = vst.msk [vmem:[%s273_s17] sm:$0xff] %vm278_vm0, %v444_v57 }
 0x239   : > { %v442_v58 = vpop.f32.mrf.mxu1 }
 0x23a PF: > { %s17_s24 = sadd.s32 1, %s584_s24  }
 0x23b   : > { %p14_p4 = scmp.ge.s32.totalorder %s17_s24, 4  }
 0x23d   :  { %16 = sbr.rel (!%p14_p4) target bundleno = 1 (0x1), region = 78 }

// kernel: gpt2_classifier_forward.17
= control target key start
LH: loop header
LB: loop body
LE: loop exit
PB: predicated region body
PF: predicated region fallthrough
CT: control target
= control target key end

     0   :  { %s391_s15 = smov 0   ;;  %s430_s0 = inlined_call_operand.vmem [shape: f32[16,32], index: 0, kind: input, shape index: {}]   ;;  %s431_s1 = inlined_call_operand.vmem [shape: f32[1,32], index: 1, kind: input, shape index: {}]   ;;  %s432_s2 = inlined_call_operand.vmem [shape: f32[1,32], index: 2, kind: input, shape index: {}]   ;;  %s433_s3 = inlined_call_operand.vmem [shape: bf16[32,128], index: 3, kind: input, shape index: {}]   ;;  %s434_s4 = inlined_call_operand.vmem [shape: f32[16,128], index: 4, kind: output, shape index: {}]  }
   0x1 LB: > { %s322_s16 = sadd.s32 4294967295, %s363_s15   ;;  %p326_p0 = scmp.ge.s32.totalorder %s363_s15, 1  ;;  %s363_s15 = sphi %s391_s15, %s14_s15  }
   0x2   : > { %p161_p1 = scmp.lt.s32.totalorder %s363_s15, 3 }
   0x4   : > { %p162_p2 = pnand %p326_p0, %p161_p1 }
   0x5   : > { %p185_p3 = scmp.lt.s32.totalorder (!%p162_p2), %s322_s16, 1 }
   0x6   : > { %165 = sbr.rel (%p162_p2) target bundleno = 419 (0x1a3), region = 36 }
   0xb   : > { %s436_s16 = smov (!%p185_p3, %s322_s16), 1  ;;  %vm197_vm0 = vcmask 261120   ;;  %v365_v2 = vmov 32.0   ;;  %v341_v14 = vld [vmem:[%s433_s3 + $0x8] sm:$0xff]  ;;  %v340_v15 = vld [vmem:[%s433_s3] sm:$0xff] }
   0xc   : > { %s327_s17 = sshll.u32 %s436_s16, 3  ;;  %353 = vrcp.f32 %v365_v2  ;;  %261 = vmatpush.bf16.msra.mxu0 %v341_v14  ;;  %v351_v25 = vld [vmem:[%s431_s1] ss:$0 sm:$0xff] }
   0xd   : > { %s188_s20 = scalar_lea.vmem %s430_s0, %s327_s17  ;;  %v352_v28 = vld [vmem:[%s432_s2] ss:$0 sm:$0xff]  ;;  %s192_s5 = scalar_lea.vmem %s434_s4, %s327_s17 }
   0xe   : > { %v194_v0 = vld [vmem:[%s188_s20] sm:$0xff] }
   0xf   : > { %v198_v1 = vsel %vm197_vm0, %v194_v0, 0.0 }
  0x10   : > { %199 = vadd.xlane.f32.xlu0 %v198_v1  ;;  %262 = vmatpush.bf16.msra.mxu0 %v340_v15 }
  0x12   : > { %v354_v3 = vpop.eup %353 }
  0x13   : > { %v202_v4 = vmul.f32 32.0, %v354_v3  ;;  %vm206_vm1 = vweird.f32 %v354_v3 }
  0x15   : > { %v203_v5 = vsub.f32 1.0, %v202_v4 }
  0x17   : > { %v204_v6 = vmul.f32 %v354_v3, %v203_v5 }
  0x19   : > { %v205_v7 = vadd.f32 %v354_v3, %v204_v6 }
  0x1b   : > { %v207_v8 = vsel %vm206_vm1, %v354_v3, %v205_v7 }
  0x83   : > { %v200_v9 = vpop.xlane.xlu0 %199 }
  0x84   : > { %v208_v10 = vmul.f32 %v207_v8, %v200_v9 }
  0x86   : > { %v209_v11 = vsub.f32 %v194_v0, %v208_v10 }
  0x88   : > { %v210_v12 = vmul.f32 %v209_v11, %v209_v11 }
  0x8a   : > { %v211_v13 = vsel %vm197_vm0, %v210_v12, 0.0 }
  0x8b   : > { %212 = vadd.xlane.f32.xlu0 %v211_v13 }
  0xfe   : > { %v213_v16 = vpop.xlane.xlu0 %212 }
  0xff   : > { %v214_v17 = vmul.f32 %v213_v16, %v207_v8 }
 0x101   : > { %v215_v18 = vadd.f32 1e-05, %v214_v17 }
 0x103   : > { %355 = vrsqrt.f32 %v215_v18  ;;  %vm222_vm3 = vweird.f32 %v215_v18 }
 0x109   : > { %v356_v19 = vpop.eup %355 }
 0x10a   : > { %v217_v20 = vmul.f32 %v356_v19, %v215_v18  ;;  %vm223_vm2 = vweird.f32 %v356_v19 }
 0x10b   : > { %vm224_vm4 = vmor %vm222_vm3, %vm223_vm2 }
 0x10c   : > { %v218_v21 = vmul.f32 %v356_v19, %v217_v20 }
 0x10e   : > { %v219_v22 = vmul.f32 0.5, %v218_v21 }
 0x110   : > { %v220_v23 = vsub.f32 1.5, %v219_v22 }
 0x112   : > { %v221_v24 = vmul.f32 %v356_v19, %v220_v23 }
 0x114   : > { %v225_v26 = vsel %vm224_vm4, %v356_v19, %v221_v24 }
 0x115   : > { %v226_v27 = vmul.f32 %v225_v26, %v209_v11 }
 0x117   : > { %v230_v29 = vmul.f32 %v351_v25, %v226_v27 }
 0x119   : > { %v234_v30 = vadd.f32 %v352_v28, %v230_v29 }
 0x11b   : > { %v235_v31 = vpack.c.bf16 %v234_v30, %v234_v30 }
 0x11d   : > { %337 = vmatmul.msk.bf16.vlgmr.msra.gmra.mxu0 %vm197_vm0, %v235_v31 }
 0x19a   : > { %v264_v32 = vpop.f32.mrf.mxu0 }
 0x19b   : > { %268 = vst [vmem:[%s192_s5] sm:$0xff] %v264_v32 }
 0x1a2   : > { %v266_v33 = vpop.f32.mrf.mxu0 }
 0x1a3 PF: > { %s14_s15 = sadd.s32 1, %s363_s15  }
 0x1a4   : > { %p11_p4 = scmp.ge.s32.totalorder %s14_s15, 4  }
 0x1a6   :  { %13 = sbr.rel (!%p11_p4) target bundleno = 1 (0x1), region = 66 }

</bundles_post_ra>
